<compile_context>
chip_gen: v6e
topology: v6e:2x2x1
jax: 0.10.0
libtpu: 0.0.40
codegen_flags: <defaults>
</compile_context>

<pallas_src>
import jax
import jax.numpy as jnp
import numpy as np
from jax.experimental import pallas as pl
from jax.experimental.pallas import tpu as pltpu


# -----------------------------------------------------------------------------
# Fused kernel: conv1 + mask fusion -> ReLU -> head(+upsample folded) -> blend.
# All refs are (rows, lanes) tiles in the row-pair layout described above.
# -----------------------------------------------------------------------------
def fused_kernel(gamma_ref, patches_ref, w2_ref, b2_ref, w3_ref, b3_ref,
                 e_ref, img_ref, hsv_ref, mask_ref, out_ref):
    # backbone conv1 + mask_conv + ScaleLayer 'sum' fusion as ONE matmul
    # (ScaleLayer already folded into the mask columns of w2/b2 by the wrapper).
    feat = jnp.dot(patches_ref[...], w2_ref[...],
                   preferred_element_type=jnp.float32) + b2_ref[...]
    feat = jnp.maximum(feat, 0.0)                                       # ReLU
    # model head (1x1 conv, 64 -> 3) with the 2x nearest-neighbour upsample
    # folded into the output columns of w3: result lands directly in the
    # full-resolution (rows, 2*W*3) output layout.
    up = jnp.dot(feat.astype(jnp.bfloat16), w3_ref[...],
                 preferred_element_type=jnp.float32) + b3_ref[...]
    # broadcast the (rows, 2*W) mask over RGB via a 0/1 selection matmul.
    mask3 = jnp.dot(mask_ref[...], e_ref[...],
                    preferred_element_type=jnp.float32)
    # masked residual blend: out = image + mask * (up + gamma * hsv)
    out_ref[...] = img_ref[...] + mask3 * (up + gamma_ref[0] * hsv_ref[...])


# -----------------------------------------------------------------------------
# Parameters (deterministic synthetic init; shapes implied by __init__).
# -----------------------------------------------------------------------------
def init_params(key, backbone_conv1_channels=64):
    ks = jax.random.split(key, 6)
    c = backbone_conv1_channels
    return dict(
        # mask_conv: Conv2d(1, c, k=3, s=2, p=1, bias=True) -> flat (9, c)
        w_mask=0.1 * jax.random.normal(ks[0], (9 * 1, c), jnp.float32),
        b_mask=0.02 * jax.random.normal(ks[1], (1, c), jnp.float32),
        # ScaleLayer(init_value=0.1)
        mask_scale=jnp.array([0.1], jnp.float32),
        # synthetic backbone conv1: Conv2d(3, c, k=3, s=2, p=1) -> flat (27, c)
        w_img=0.1 * jax.random.normal(ks[2], (9 * 3, c), jnp.float32),
        b_img=0.02 * jax.random.normal(ks[3], (1, c), jnp.float32),
        # synthetic model head: 1x1 conv c -> 3
        w_head=0.1 * jax.random.normal(ks[4], (c, 3), jnp.float32),
        b_head=0.02 * jax.random.normal(ks[5], (1, 3), jnp.float32),
        # synthetic model hsv mixing coefficient
        gamma=jnp.array([0.1], jnp.float32),
    )


# -----------------------------------------------------------------------------
# Forward pass (mirrors IHModelWithBackboneMhead.forward with mask_fusion='sum',
# downsize_backbone_input=False).
# -----------------------------------------------------------------------------
def ih_model_forward(params, image_nchw, hsv_nchw, mask_nchw, *, tile_rows=512):
    n, _, h, w = image_nchw.shape
    ho, wo = h // 2, w // 2
    cmid = params['w_img'].shape[1]                         # 64

    # NCHW -> NHWC layout glue (unavoidable given channel-major inputs).
    image = jnp.transpose(image_nchw, (0, 2, 3, 1))         # (N,H,W,3)
    hsv = jnp.transpose(hsv_nchw, (0, 2, 3, 1))
    mask = jnp.transpose(mask_nchw, (0, 2, 3, 1))           # (N,H,W,1)

    # ---- conv patches (im2col) in bf16, row-pair (half-res-row) layout -------
    # backbone_mask = cat(mask, 1-mask): only [:, :1] (= mask) is consumed by
    # the 'sum' fusion path, so the (1 - mask) half is never materialized.
    # TODO(synk): in-kernel stride-2 patch construction (to drop this wrapper-
    # side im2col entirely) needs strided lane gathers; kept wrapper-side in
    # bf16 to halve its HBM cost instead.
    xp = jnp.pad(image, ((0, 0), (1, 1), (1, 1), (0, 0)))
    mp = jnp.pad(mask, ((0, 0), (1, 1), (1, 1), (0, 0)))
    cols = []
    for src in (xp, mp):                                    # image(27) then mask(9)
        for kh in range(3):
            for kw in range(3):
                cols.append(src[:, kh:kh + 2 * ho:2, kw:kw + 2 * wo:2, :])
    patches = jnp.concatenate(cols, axis=-1)                # (N,Ho,Wo,36)
    patches = patches.reshape(n * ho, wo * 36).astype(jnp.bfloat16)

    # ---- fold ScaleLayer into the conv weights (per call: scale stays live) --
    scale = params['mask_scale'][0]
    wfold = jnp.concatenate([params['w_img'], scale * params['w_mask']], axis=0)
    bfold = params['b_img'] + scale * params['b_mask']      # (1, 64)
    eye_wo = jnp.eye(wo, dtype=jnp.float32)
    w2 = jnp.kron(eye_wo, wfold).astype(jnp.bfloat16)       # (Wo*36, Wo*64)
    b2 = jnp.tile(bfold, (1, wo))                           # (1, Wo*64)

    # ---- fold head 1x1 conv + 2x nearest upsample into one weight matrix -----
    lane = np.arange(2 * w * 3)
    h_off = lane // (w * 3)
    rem = lane % (w * 3)
    w_idx = rem // 3
    c_idx = rem % 3
    src_col = (w_idx // 2) * 3 + c_idx                      # pred column per out lane
    w_head2 = jnp.kron(eye_wo, params['w_head'])            # (Wo*64, Wo*3)
    w3 = w_head2[:, src_col].astype(jnp.bfloat16)           # (Wo*64, 2*W*3)
    b3 = params['b_head'][0, c_idx][None, :]                # (1, 2*W*3)

    # 0/1 selection matrix: broadcast (rows, 2W) mask over RGB inside the kernel.
    m_src = h_off * w + w_idx
    e_mat = jnp.asarray(
        (np.arange(2 * w)[:, None] == m_src[None, :]).astype(np.float32))

    # ---- blend inputs in lane-dense row-pair layout ---------------------------
    img_rows = image.reshape(n * ho, 2 * w * 3)
    hsv_rows = hsv.reshape(n * ho, 2 * w * 3)
    mask_rows = mask.reshape(n * ho, 2 * w)

    # ---- grid / tiling --------------------------------------------------------
    m_rows = n * ho
    if m_rows >= 32:
        # multiple of 16 (bf16 sublane tile) and >=2 grid steps for megacore.
        tr = max(16, (min(tile_rows, m_rows // 2) // 16) * 16)
    else:
        tr = m_rows                                          # single full block
    grid = (pl.cdiv(m_rows, tr),)

    out_rows = pl.pallas_call(
        fused_kernel,
        out_shape=jax.ShapeDtypeStruct((m_rows, 2 * w * 3), jnp.float32),
        grid=grid,
        in_specs=[
            pl.BlockSpec(memory_space=pltpu.MemorySpace.SMEM),        # gamma (1,)
            pl.BlockSpec((tr, wo * 36), lambda i: (i, 0)),            # patches
            pl.BlockSpec((wo * 36, wo * cmid), lambda i: (0, 0)),     # w2 (resident)
            pl.BlockSpec((1, wo * cmid), lambda i: (0, 0)),           # b2
            pl.BlockSpec((wo * cmid, 2 * w * 3), lambda i: (0, 0)),   # w3 (resident)
            pl.BlockSpec((1, 2 * w * 3), lambda i: (0, 0)),           # b3
            pl.BlockSpec((2 * w, 2 * w * 3), lambda i: (0, 0)),       # mask-expand E
            pl.BlockSpec((tr, 2 * w * 3), lambda i: (i, 0)),          # image rows
            pl.BlockSpec((tr, 2 * w * 3), lambda i: (i, 0)),          # hsv rows
            pl.BlockSpec((tr, 2 * w), lambda i: (i, 0)),              # mask rows
        ],
        out_specs=pl.BlockSpec((tr, 2 * w * 3), lambda i: (i, 0)),
        compiler_params=pltpu.CompilerParams(
            dimension_semantics=("parallel",),
            vmem_limit_bytes=32 * 1024 * 1024),
    )(params['gamma'], patches, w2, b2, w3, b3, e_mat,
      img_rows, hsv_rows, mask_rows)

    out = out_rows.reshape(n, h, w, 3)
    # TODO(synk): downsize_backbone_input bilinear resize and the 'rgb'
    # SimpleInputFusion path are not exercised (defaults False / 'sum').
    return jnp.transpose(out, (0, 3, 1, 2))                  # back to NCHW


# -----------------------------------------------------------------------------
# Pure-JAX reference (same math; mirrors the kernel's bf16 MXU operands so the
# tolerance can be tight).
# -----------------------------------------------------------------------------
def reference_forward(params, image_nchw, hsv_nchw, mask_nchw):
    image = jnp.transpose(image_nchw, (0, 2, 3, 1))
    hsv = jnp.transpose(hsv_nchw, (0, 2, 3, 1))
    mask = jnp.transpose(mask_nchw, (0, 2, 3, 1))

    def rnd(x):                                  # mirror bf16 MXU operands
        return x.astype(jnp.bfloat16).astype(jnp.float32)

    def conv3x3s2(x, w_flat, b):
        cin = x.shape[-1]
        wk = w_flat.reshape(3, 3, cin, -1)       # HWIO
        y = jax.lax.conv_general_dilated(
            x, wk, window_strides=(2, 2), padding=((1, 1), (1, 1)),
            dimension_numbers=('NHWC', 'HWIO', 'NHWC'),
            precision=jax.lax.Precision.HIGHEST)
        return y + b.reshape(1, 1, 1, -1)

    scale = params['mask_scale'][0]
    img_feat = conv3x3s2(rnd(image), rnd(params['w_img']), params['b_img'])
    mask_feat = conv3x3s2(rnd(mask), rnd(scale * params['w_mask']),
                          scale * params['b_mask'])
    feat = jnp.maximum(img_feat + mask_feat, 0.0)
    pred = jnp.einsum('nhwc,cd->nhwd', rnd(feat), rnd(params['w_head']),
                      precision=jax.lax.Precision.HIGHEST)
    pred = pred + params['b_head'].reshape(1, 1, 1, -1)
    up = jnp.repeat(jnp.repeat(pred, 2, axis=1), 2, axis=2)
    out = image + mask * (up + params['gamma'][0] * hsv)
    return jnp.transpose(out, (0, 3, 1, 2))


if __name__ == "__main__":
    key = jax.random.PRNGKey(0)
    kp, ki, kh_, km = jax.random.split(key, 4)
    params = init_params(kp, backbone_conv1_channels=64)

    N, H, W = 2, 32, 32
    image = jax.random.normal(ki, (N, 3, H, W), jnp.float32)
    hsv = jax.random.normal(kh_, (N, 3, H, W), jnp.float32)
    mask = (jax.random.uniform(km, (N, 1, H, W)) > 0.5).astype(jnp.float32)

    fwd = jax.jit(ih_model_forward)
    out = jax.block_until_ready(fwd(params, image, hsv, mask))

    assert out.shape == (N, 3, H, W) and out.dtype == jnp.float32
    ref = reference_forward(params, image, hsv, mask)
    # Tight tolerance: the reference mirrors the kernel's bf16 MXU operands, so
    # the only differences are f32 accumulation-order effects (~1e-6).
    np.testing.assert_allclose(np.asarray(out), np.asarray(ref),
                               rtol=1e-4, atol=1e-4)
    print("KERNEL_OK")
</pallas_src>

<mosaic_0001>
module attributes {stable_mosaic.version = 11 : i64} {
  func.func @fused_kernel(%arg0: i32, %arg1: memref<1xf32, #tpu.memory_space<smem>>, %arg2: memref<16x576xbf16, #tpu.memory_space<vmem>>, %arg3: memref<576x1024xbf16, #tpu.memory_space<vmem>>, %arg4: memref<1x1024xf32, #tpu.memory_space<vmem>>, %arg5: memref<1024x192xbf16, #tpu.memory_space<vmem>>, %arg6: memref<1x192xf32, #tpu.memory_space<vmem>>, %arg7: memref<64x192xf32, #tpu.memory_space<vmem>>, %arg8: memref<16x192xf32, #tpu.memory_space<vmem>>, %arg9: memref<16x192xf32, #tpu.memory_space<vmem>>, %arg10: memref<16x64xf32, #tpu.memory_space<vmem>>, %arg11: memref<16x192xf32, #tpu.memory_space<vmem>>) attributes {dimension_semantics = [#tpu.dimension_semantics<parallel>], iteration_bounds = array<i64: 2>, scalar_prefetch = 0 : i64, scratch_operands = 0 : i64, tpu.core_type = #tpu.core_type<tc>, window_params = [{transform_indices = @transform_0, window_bounds = array<i64: 1>}, {transform_indices = @transform_1, window_bounds = array<i64: 16, 576>}, {pipeline_mode = #tpu.pipeline_mode<synchronous>, transform_indices = @transform_2, window_bounds = array<i64: 576, 1024>}, {pipeline_mode = #tpu.pipeline_mode<synchronous>, transform_indices = @transform_3, window_bounds = array<i64: 1, 1024>}, {pipeline_mode = #tpu.pipeline_mode<synchronous>, transform_indices = @transform_4, window_bounds = array<i64: 1024, 192>}, {pipeline_mode = #tpu.pipeline_mode<synchronous>, transform_indices = @transform_5, window_bounds = array<i64: 1, 192>}, {pipeline_mode = #tpu.pipeline_mode<synchronous>, transform_indices = @transform_6, window_bounds = array<i64: 64, 192>}, {transform_indices = @transform_7, window_bounds = array<i64: 16, 192>}, {transform_indices = @transform_8, window_bounds = array<i64: 16, 192>}, {transform_indices = @transform_9, window_bounds = array<i64: 16, 64>}, {transform_indices = @transform_10, window_bounds = array<i64: 16, 192>}]} {
    %c0 = arith.constant 0 : index
    %c0_0 = arith.constant 0 : index
    %0 = vector.load %arg2[%c0, %c0_0] : memref<16x576xbf16, #tpu.memory_space<vmem>>, vector<16x576xbf16>
    %c0_1 = arith.constant 0 : index
    %c0_2 = arith.constant 0 : index
    %1 = vector.load %arg3[%c0_1, %c0_2] : memref<576x1024xbf16, #tpu.memory_space<vmem>>, vector<576x1024xbf16>
    %cst = arith.constant dense<0.000000e+00> : vector<16x1024xf32>
    %2 = tpu.matmul %0, %1, %cst {dimension_numbers = #tpu.dot_dimension_numbers<[1], [0], [0], [1], [0, 0, 1, 1], [], []>} : vector<16x576xbf16>, vector<576x1024xbf16>, vector<16x1024xf32> -> vector<16x1024xf32>
    %c0_3 = arith.constant 0 : index
    %c0_4 = arith.constant 0 : index
    %3 = vector.load %arg4[%c0_3, %c0_4] : memref<1x1024xf32, #tpu.memory_space<vmem>>, vector<1x1024xf32>
    %4 = vector.broadcast %3 : vector<1x1024xf32> to vector<16x1024xf32>
    %5 = arith.addf %2, %4 : vector<16x1024xf32>
    %cst_5 = arith.constant 0.000000e+00 : f32
    %6 = vector.broadcast %cst_5 : f32 to vector<16x1024xf32>
    %7 = arith.maximumf %5, %6 : vector<16x1024xf32>
    %8 = arith.truncf %7 : vector<16x1024xf32> to vector<16x1024xbf16>
    %c0_6 = arith.constant 0 : index
    %c0_7 = arith.constant 0 : index
    %9 = vector.load %arg5[%c0_6, %c0_7] : memref<1024x192xbf16, #tpu.memory_space<vmem>>, vector<1024x192xbf16>
    %cst_8 = arith.constant dense<0.000000e+00> : vector<16x192xf32>
    %10 = tpu.matmul %8, %9, %cst_8 {dimension_numbers = #tpu.dot_dimension_numbers<[1], [0], [0], [1], [0, 0, 1, 1], [], []>} : vector<16x1024xbf16>, vector<1024x192xbf16>, vector<16x192xf32> -> vector<16x192xf32>
    %c0_9 = arith.constant 0 : index
    %c0_10 = arith.constant 0 : index
    %11 = vector.load %arg6[%c0_9, %c0_10] : memref<1x192xf32, #tpu.memory_space<vmem>>, vector<1x192xf32>
    %12 = vector.broadcast %11 : vector<1x192xf32> to vector<16x192xf32>
    %13 = arith.addf %10, %12 : vector<16x192xf32>
    %c0_11 = arith.constant 0 : index
    %c0_12 = arith.constant 0 : index
    %14 = vector.load %arg10[%c0_11, %c0_12] : memref<16x64xf32, #tpu.memory_space<vmem>>, vector<16x64xf32>
    %c0_13 = arith.constant 0 : index
    %c0_14 = arith.constant 0 : index
    %15 = vector.load %arg7[%c0_13, %c0_14] : memref<64x192xf32, #tpu.memory_space<vmem>>, vector<64x192xf32>
    %cst_15 = arith.constant dense<0.000000e+00> : vector<16x192xf32>
    %16 = tpu.matmul %14, %15, %cst_15 {dimension_numbers = #tpu.dot_dimension_numbers<[1], [0], [0], [1], [0, 0, 1, 1], [], []>} : vector<16x64xf32>, vector<64x192xf32>, vector<16x192xf32> -> vector<16x192xf32>
    %c0_16 = arith.constant 0 : index
    %c0_17 = arith.constant 0 : index
    %17 = vector.load %arg8[%c0_16, %c0_17] : memref<16x192xf32, #tpu.memory_space<vmem>>, vector<16x192xf32>
    %c0_18 = arith.constant 0 : index
    %18 = memref.load %arg1[%c0_18] : memref<1xf32, #tpu.memory_space<smem>>
    %c0_19 = arith.constant 0 : index
    %c0_20 = arith.constant 0 : index
    %19 = vector.load %arg9[%c0_19, %c0_20] : memref<16x192xf32, #tpu.memory_space<vmem>>, vector<16x192xf32>
    %20 = vector.broadcast %18 : f32 to vector<16x192xf32>
    %21 = arith.mulf %20, %19 : vector<16x192xf32>
    %22 = arith.addf %13, %21 : vector<16x192xf32>
    %23 = arith.mulf %16, %22 : vector<16x192xf32>
    %24 = arith.addf %17, %23 : vector<16x192xf32>
    %c0_21 = arith.constant 0 : index
    %c0_22 = arith.constant 0 : index
    %25 = vector.load %arg11[%c0_21, %c0_22] : memref<16x192xf32, #tpu.memory_space<vmem>>, vector<16x192xf32>
    tpu.vector_store %arg11[%c0_21, %c0_22], %24 {strides = array<i32>} : memref<16x192xf32, #tpu.memory_space<vmem>>, vector<16x192xf32>,
    return
  }
  func.func @transform_0(%arg0: i32) -> i32 {
    %c0_i32 = arith.constant 0 : i32
    %c0_i32_0 = arith.constant 0 : i32
    return %c0_i32 : i32
  }
  func.func @transform_1(%arg0: i32) -> (i32, i32) {
    %c0_i32 = arith.constant 0 : i32
    %c0_i32_0 = arith.constant 0 : i32
    return %arg0, %c0_i32 : i32, i32
  }
  func.func @transform_2(%arg0: i32) -> (i32, i32) {
    %c0_i32 = arith.constant 0 : i32
    %c0_i32_0 = arith.constant 0 : i32
    %c0_i32_1 = arith.constant 0 : i32
    return %c0_i32, %c0_i32_0 : i32, i32
  }
  func.func @transform_3(%arg0: i32) -> (i32, i32) {
    %c0_i32 = arith.constant 0 : i32
    %c0_i32_0 = arith.constant 0 : i32
    %c0_i32_1 = arith.constant 0 : i32
    return %c0_i32, %c0_i32_0 : i32, i32
  }
  func.func @transform_4(%arg0: i32) -> (i32, i32) {
    %c0_i32 = arith.constant 0 : i32
    %c0_i32_0 = arith.constant 0 : i32
    %c0_i32_1 = arith.constant 0 : i32
    return %c0_i32, %c0_i32_0 : i32, i32
  }
  func.func @transform_5(%arg0: i32) -> (i32, i32) {
    %c0_i32 = arith.constant 0 : i32
    %c0_i32_0 = arith.constant 0 : i32
    %c0_i32_1 = arith.constant 0 : i32
    return %c0_i32, %c0_i32_0 : i32, i32
  }
  func.func @transform_6(%arg0: i32) -> (i32, i32) {
    %c0_i32 = arith.constant 0 : i32
    %c0_i32_0 = arith.constant 0 : i32
    %c0_i32_1 = arith.constant 0 : i32
    return %c0_i32, %c0_i32_0 : i32, i32
  }
  func.func @transform_7(%arg0: i32) -> (i32, i32) {
    %c0_i32 = arith.constant 0 : i32
    %c0_i32_0 = arith.constant 0 : i32
    return %arg0, %c0_i32 : i32, i32
  }
  func.func @transform_8(%arg0: i32) -> (i32, i32) {
    %c0_i32 = arith.constant 0 : i32
    %c0_i32_0 = arith.constant 0 : i32
    return %arg0, %c0_i32 : i32, i32
  }
  func.func @transform_9(%arg0: i32) -> (i32, i32) {
    %c0_i32 = arith.constant 0 : i32
    %c0_i32_0 = arith.constant 0 : i32
    return %arg0, %c0_i32 : i32, i32
  }
  func.func @transform_10(%arg0: i32) -> (i32, i32) {
    %c0_i32 = arith.constant 0 : i32
    %c0_i32_0 = arith.constant 0 : i32
    return %arg0, %c0_i32 : i32, i32
  }
}

</mosaic_0001>

<bundles_post_ra>
// kernel: ih_model_forward.1
= control target key start
LH: loop header
LB: loop body
LE: loop exit
PB: predicated region body
PF: predicated region fallthrough
CT: control target
= control target key end

     0   :  { %s4713_s15 = smov 0   ;;  %s6210_s0 = inlined_call_operand.<no memory space> [shape: f32[1], index: 0, kind: input, shape index: {}]   ;;  %s6211_s1 = inlined_call_operand.vmem [shape: bf16[32,576], index: 1, kind: input, shape index: {}]   ;;  %s6212_s2 = inlined_call_operand.vmem [shape: bf16[576,1024], index: 2, kind: input, shape index: {}]   ;;  %s6213_s3 = inlined_call_operand.vmem [shape: f32[1,1024], index: 3, kind: input, shape index: {}]   ;;  %s6214_s4 = inlined_call_operand.vmem [shape: bf16[1024,192], index: 4, kind: input, shape index: {}]   ;;  %s6215_s5 = inlined_call_operand.vmem [shape: f32[1,192], index: 5, kind: input, shape index: {}]   ;;  %s6216_s6 = inlined_call_operand.vmem [shape: f32[64,192], index: 6, kind: input, shape index: {}]   ;;  %s6217_s7 = inlined_call_operand.vmem [shape: f32[32,192], index: 7, kind: input, shape index: {}]   ;;  %s6218_s8 = inlined_call_operand.vmem [shape: f32[32,192], index: 8, kind: input, shape index: {}]   ;;  %s6219_s9 = inlined_call_operand.vmem [shape: f32[32,64], index: 9, kind: input, shape index: {}]   ;;  %s6220_s10 = inlined_call_operand.vmem [shape: f32[32,192], index: 10, kind: output, shape index: {}]  }
   0x1   :  { %15 = sst [smem:[#allocation2]] %s6210_s0 }
   0x2 LB: > { %s3964_s16 = sadd.s32 4294967295, %s4651_s15   ;;  %p3968_p0 = scmp.ge.s32.totalorder %s4651_s15, 1  ;;  %s4651_s15 = sphi %s4713_s15, %s21_s15  }
   0x3   : > { %p350_p1 = scmp.lt.s32.totalorder %s4651_s15, 3 }
   0x5   : > { %p351_p2 = pnand %p3968_p0, %p350_p1 }
   0x6   : > { %s3969_s21 = sshll.u32 (!%p351_p2), %s3964_s16, 1  ;;  %s3844_s22 = sld [smem:[#allocation2]] (!%p351_p2) }
   0x7   : > { %354 = sbr.rel (%p351_p2) target bundleno = 730 (0x2da), region = 60  ;;  %p408_p3 = scmp.lt.s32.totalorder (!%p351_p2), %s3969_s21, 3 }
   0xc   : > { %v504_v0 = vld [vmem:[%s6212_s2 + $0x1c0] sm:$0xff]  ;;  %s6222_s21 = smov (!%p408_p3, %s3969_s21), 3  ;;  %vm2243_vm0 = vcmask 523264  }
   0xd   : > { %v508_v1 = vld [vmem:[%s6212_s2 + $0x1e0] sm:$0xff]  ;;  %s4430_s27 = smul.u32 20, %s6222_s21  ;;  %s3978_s25 = sshll.u32 %s6222_s21, 3 }
   0xe   : > { %v632_v2 = vld [vmem:[%s6212_s2 + $0x5c0] sm:$0xff]  ;;  %v4044_v3 = vcombine.high %v504_v0, %v508_v1  ;;  %v4043_v5 = vcombine.low %v504_v0, %v508_v1  ;;  %s6144_s13 = scalar_lea.vmem %s6219_s9, %s3978_s25  ;;  %s6177_s23 = sshll.u32 %s6222_s21, 4 }
   0xf   : > { %v636_v4 = vld [vmem:[%s6212_s2 + $0x5e0] sm:$0xff]  ;;  %s4811_s0 = scalar_lea.vmem %s6211_s1, %s4430_s27  ;;  %s6185_s26 = scalar_lea.vmem %s6218_s8, %s6177_s23 }
  0x10   : > { %v496_v6 = vld [vmem:[%s6212_s2 + $0x180] sm:$0xff]  ;;  %v4172_v8 = vcombine.high %v632_v2, %v636_v4  ;;  %v4171_v9 = vcombine.low %v632_v2, %v636_v4  ;;  %2247 = vmatprep.subr.bf16.mxu0 %v4044_v3  ;;  %s6193_s28 = scalar_lea.vmem %s6217_s7, %s6177_s23  ;;  %s439_s30 = scalar_lea.vmem %s6220_s10, %s6177_s23 }
  0x11   : > { %v500_v7 = vld [vmem:[%s6212_s2 + $0x1a0] sm:$0xff]  ;;  %2248 = vmatpush1.bf16.msra.mxu0 %v4043_v5 }
  0x12   : > { %v4036_v10 = vcombine.high %v496_v6, %v500_v7  ;;  %v624_v11 = vld [vmem:[%s6212_s2 + $0x580] sm:$0xff]  ;;  %2290 = vmatprep.subr.bf16.mxu1 %v4172_v8  ;;  %v4035_v18 = vcombine.low %v496_v6, %v500_v7 }
  0x13   : > { %v628_v12 = vld [vmem:[%s6212_s2 + $0x5a0] sm:$0xff]  ;;  %2291 = vmatpush1.bf16.msra.mxu1 %v4171_v9 }
  0x14   : > { %v488_v13 = vld [vmem:[%s6212_s2 + $0x140] sm:$0xff]  ;;  %v4164_v14 = vcombine.high %v624_v11, %v628_v12  ;;  %2249 = vmatprep.subr.bf16.mxu0 %v4036_v10  ;;  %v4163_v19 = vcombine.low %v624_v11, %v628_v12 }
  0x15   : > { %v492_v15 = vld [vmem:[%s6212_s2 + $0x160] sm:$0xff]  ;;  %2250 = vmatpush1.bf16.msra.mxu0 %v4035_v18 }
  0x16   : > { %v616_v16 = vld [vmem:[%s6212_s2 + $0x540] sm:$0xff]  ;;  %v4028_v20 = vcombine.high %v488_v13, %v492_v15  ;;  %2292 = vmatprep.subr.bf16.mxu1 %v4164_v14  ;;  %v4027_v26 = vcombine.low %v488_v13, %v492_v15 }
  0x17   : > { %v620_v17 = vld [vmem:[%s6212_s2 + $0x560] sm:$0xff]  ;;  %2293 = vmatpush1.bf16.msra.mxu1 %v4163_v19 }
  0x18   : > { %v4156_v21 = vcombine.high %v616_v16, %v620_v17  ;;  %v480_v22 = vld [vmem:[%s6212_s2 + $0x100] sm:$0xff]  ;;  %2251 = vmatprep.subr.bf16.mxu0 %v4028_v20  ;;  %v4155_v27 = vcombine.low %v616_v16, %v620_v17 }
  0x19   : > { %v484_v23 = vld [vmem:[%s6212_s2 + $0x120] sm:$0xff]  ;;  %2252 = vmatpush1.bf16.msra.mxu0 %v4027_v26 }
  0x1a   : > { %v608_v24 = vld [vmem:[%s6212_s2 + $0x500] sm:$0xff]  ;;  %v4020_v28 = vcombine.high %v480_v22, %v484_v23  ;;  %2294 = vmatprep.subr.bf16.mxu1 %v4156_v21  ;;  %v4019_v34 = vcombine.low %v480_v22, %v484_v23 }
  0x1b   : > { %v612_v25 = vld [vmem:[%s6212_s2 + $0x520] sm:$0xff]  ;;  %2295 = vmatpush1.bf16.msra.mxu1 %v4155_v27 }
  0x1c   : > { %v4148_v29 = vcombine.high %v608_v24, %v612_v25  ;;  %v472_v30 = vld [vmem:[%s6212_s2 + $0xc0] sm:$0xff]  ;;  %2253 = vmatprep.subr.bf16.mxu0 %v4020_v28  ;;  %v4147_v35 = vcombine.low %v608_v24, %v612_v25 }
  0x1d   : > { %v476_v31 = vld [vmem:[%s6212_s2 + $0xe0] sm:$0xff]  ;;  %2254 = vmatpush1.bf16.msra.mxu0 %v4019_v34 }
  0x1e   : > { %v600_v32 = vld [vmem:[%s6212_s2 + $0x4c0] sm:$0xff]  ;;  %v4012_v36 = vcombine.high %v472_v30, %v476_v31  ;;  %2296 = vmatprep.subr.bf16.mxu1 %v4148_v29  ;;  %v4011_v42 = vcombine.low %v472_v30, %v476_v31 }
  0x1f   : > { %v604_v33 = vld [vmem:[%s6212_s2 + $0x4e0] sm:$0xff]  ;;  %2297 = vmatpush1.bf16.msra.mxu1 %v4147_v35 }
  0x20   : > { %v4140_v37 = vcombine.high %v600_v32, %v604_v33  ;;  %v464_v38 = vld [vmem:[%s6212_s2 + $0x80] sm:$0xff]  ;;  %2255 = vmatprep.subr.bf16.mxu0 %v4012_v36  ;;  %v4139_v43 = vcombine.low %v600_v32, %v604_v33 }
  0x21   : > { %v468_v39 = vld [vmem:[%s6212_s2 + $0xa0] sm:$0xff]  ;;  %2256 = vmatpush1.bf16.msra.mxu0 %v4011_v42 }
  0x22   : > { %v592_v40 = vld [vmem:[%s6212_s2 + $0x480] sm:$0xff]  ;;  %v4004_v44 = vcombine.high %v464_v38, %v468_v39  ;;  %2298 = vmatprep.subr.bf16.mxu1 %v4140_v37  ;;  %v4003_v50 = vcombine.low %v464_v38, %v468_v39 }
  0x23   : > { %v596_v41 = vld [vmem:[%s6212_s2 + $0x4a0] sm:$0xff]  ;;  %2299 = vmatpush1.bf16.msra.mxu1 %v4139_v43 }
  0x24   : > { %v4132_v45 = vcombine.high %v592_v40, %v596_v41  ;;  %v456_v46 = vld [vmem:[%s6212_s2 + $0x40] sm:$0xff]  ;;  %2257 = vmatprep.subr.bf16.mxu0 %v4004_v44  ;;  %v4131_v52 = vcombine.low %v592_v40, %v596_v41 }
  0x25   : > { %v460_v47 = vld [vmem:[%s6212_s2 + $0x60] sm:$0xff]  ;;  %2258 = vmatpush1.bf16.msra.mxu0 %v4003_v50 }
  0x26   : > { %v584_v48 = vld [vmem:[%s6212_s2 + $0x440] sm:$0xff]  ;;  %v3996_v53 = vcombine.high %v456_v46, %v460_v47  ;;  %2300 = vmatprep.subr.bf16.mxu1 %v4132_v45  ;;  %v3995_v60 = vcombine.low %v456_v46, %v460_v47 }
  0x27   : > { %v588_v49 = vld [vmem:[%s6212_s2 + $0x460] sm:$0xff]  ;;  %2301 = vmatpush1.bf16.msra.mxu1 %v4131_v52 }
  0x28   : > { %v448_v51 = vld [vmem:[%s6212_s2] sm:$0xff]  ;;  %v4124_v55 = vcombine.high %v584_v48, %v588_v49  ;;  %2259 = vmatprep.subr.bf16.mxu0 %v3996_v53  ;;  %v4123_v61 = vcombine.low %v584_v48, %v588_v49 }
  0x29   : > { %v452_v54 = vld [vmem:[%s6212_s2 + $0x20] sm:$0xff]  ;;  %2260 = vmatpush1.bf16.msra.mxu0 %v3995_v60 }
  0x2a   : > { %v4820_v56 = vld [vmem:[%s4811_s0 + $0x4] ss:$20 sps:$4 sm:$0xff]   ;;  %v4829_v59 = vld [vmem:[%s4811_s0 + $0xc] ss:$20 sps:$4 sm:$0xff]   ;;  %v3988_v62 = vcombine.high %v448_v51, %v452_v54  ;;  %2302 = vmatprep.subr.bf16.mxu1 %v4124_v55  ;;  %v3987_v4 = vcombine.low %v448_v51, %v452_v54 }
  0x2b   : > { %v576_v57 = vld [vmem:[%s6212_s2 + $0x400] sm:$0xff]  ;;  %2279 = vmatprep.mubr.bf16.mxu0 %v4820_v56  ;;  %2322 = vmatprep.mubr.bf16.mxu1 %v4829_v59 }
  0x2c   : > { %v580_v58 = vld [vmem:[%s6212_s2 + $0x420] sm:$0xff]  ;;  %2303 = vmatpush1.bf16.msra.mxu1 %v4123_v61  ;;  %2261 = vmatprep.subr.bf16.mxu0 %v3988_v62 }
  0x2d   : > { %v4116_v63 = vcombine.high %v576_v57, %v580_v58  ;;  %v568_v0 = vld [vmem:[%s6212_s2 + $0x3c0] sm:$0xff]  ;;  %v4115_v5 = vcombine.low %v576_v57, %v580_v58  ;;  %2262 = vmatpush1.bf16.msra.mxu0 %v3987_v4  ;;  %v505_v4 = vld [vmem:[%s6212_s2 + $0x1c8] sm:$0xff] }
  0x2e   : > { %v572_v1 = vld [vmem:[%s6212_s2 + $0x3e0] sm:$0xff] }
  0x2f   : > { %v696_v2 = vld [vmem:[%s6212_s2 + $0x7c0] sm:$0xff]  ;;  %v4108_v6 = vcombine.high %v568_v0, %v572_v1  ;;  %2304 = vmatprep.subr.bf16.mxu1 %v4116_v63  ;;  %v4107_v12 = vcombine.low %v568_v0, %v572_v1 }
  0x30   : > { %v700_v3 = vld [vmem:[%s6212_s2 + $0x7e0] sm:$0xff]  ;;  %2305 = vmatpush1.bf16.msra.mxu1 %v4115_v5  ;;  %v509_v5 = vld [vmem:[%s6212_s2 + $0x1e8] sm:$0xff] }
  0x31   : > { %v4236_v7 = vcombine.high %v696_v2, %v700_v3  ;;  %v560_v8 = vld [vmem:[%s6212_s2 + $0x380] sm:$0xff]  ;;  %2263 = vmatprep.subr.bf16.mxu0 %v4108_v6  ;;  %v4235_v13 = vcombine.low %v696_v2, %v700_v3 }
  0x32   : > { %v564_v9 = vld [vmem:[%s6212_s2 + $0x3a0] sm:$0xff]  ;;  %2264 = vmatpush2.bf16.msra.mxu0 %v4107_v12 }
  0x33   : > { %v688_v10 = vld [vmem:[%s6212_s2 + $0x780] sm:$0xff]  ;;  %v4100_v14 = vcombine.high %v560_v8, %v564_v9  ;;  %2306 = vmatprep.subr.bf16.mxu1 %v4236_v7  ;;  %v4099_v20 = vcombine.low %v560_v8, %v564_v9  ;;  %v4046_v9 = vcombine.high %v505_v4, %v509_v5 }
  0x34   : > { %v692_v11 = vld [vmem:[%s6212_s2 + $0x7a0] sm:$0xff]  ;;  %2307 = vmatpush2.bf16.msra.mxu1 %v4235_v13  ;;  %v497_v13 = vld [vmem:[%s6212_s2 + $0x188] sm:$0xff] }
  0x35   : > { %v4228_v15 = vcombine.high %v688_v10, %v692_v11  ;;  %v552_v16 = vld [vmem:[%s6212_s2 + $0x340] sm:$0xff]  ;;  %2265 = vmatprep.subr.bf16.mxu0 %v4100_v14  ;;  %v4227_v21 = vcombine.low %v688_v10, %v692_v11  ;;  %v501_v14 = vld [vmem:[%s6212_s2 + $0x1a8] sm:$0xff] }
  0x36   : > { %v556_v17 = vld [vmem:[%s6212_s2 + $0x360] sm:$0xff]  ;;  %2266 = vmatpush2.bf16.msra.mxu0 %v4099_v20 }
  0x37   : > { %v680_v18 = vld [vmem:[%s6212_s2 + $0x740] sm:$0xff]  ;;  %v4092_v22 = vcombine.high %v552_v16, %v556_v17  ;;  %2308 = vmatprep.subr.bf16.mxu1 %v4228_v15  ;;  %v4091_v28 = vcombine.low %v552_v16, %v556_v17  ;;  %v4957_v15 = vld [vmem:[%s4811_s0 + $0x8] ss:$20 sps:$4 sm:$0xff]   ;;  %v4045_v17 = vcombine.low %v505_v4, %v509_v5 }
  0x38   : > { %v684_v19 = vld [vmem:[%s6212_s2 + $0x760] sm:$0xff]  ;;  %2309 = vmatpush2.bf16.msra.mxu1 %v4227_v21  ;;  %v569_v5 = vld [vmem:[%s6212_s2 + $0x3c8] sm:$0xff] }
  0x39   : > { %v4220_v23 = vcombine.high %v680_v18, %v684_v19  ;;  %v544_v24 = vld [vmem:[%s6212_s2 + $0x300] sm:$0xff]  ;;  %2267 = vmatprep.subr.bf16.mxu0 %v4092_v22  ;;  %v4219_v29 = vcombine.low %v680_v18, %v684_v19  ;;  %v4038_v19 = vcombine.high %v497_v13, %v501_v14  ;;  %v489_v22 = vld [vmem:[%s6212_s2 + $0x148] sm:$0xff] }
  0x3a   : > { %v548_v25 = vld [vmem:[%s6212_s2 + $0x320] sm:$0xff]  ;;  %2268 = vmatpush2.bf16.msra.mxu0 %v4091_v28 }
  0x3b   : > { %v672_v26 = vld [vmem:[%s6212_s2 + $0x700] sm:$0xff]  ;;  %v4084_v30 = vcombine.high %v544_v24, %v548_v25  ;;  %2310 = vmatprep.subr.bf16.mxu1 %v4220_v23  ;;  %v4083_v36 = vcombine.low %v544_v24, %v548_v25  ;;  %v493_v23 = vld [vmem:[%s6212_s2 + $0x168] sm:$0xff]  ;;  %v4037_v25 = vcombine.low %v497_v13, %v501_v14 }
  0x3c   : > { %v676_v27 = vld [vmem:[%s6212_s2 + $0x720] sm:$0xff]  ;;  %2311 = vmatpush2.bf16.msra.mxu1 %v4219_v29  ;;  %v481_v29 = vld [vmem:[%s6212_s2 + $0x108] sm:$0xff] }
  0x3d   : > { %v4212_v31 = vcombine.high %v672_v26, %v676_v27  ;;  %v536_v32 = vld [vmem:[%s6212_s2 + $0x2c0] sm:$0xff]  ;;  %2269 = vmatprep.subr.bf16.mxu0 %v4084_v30  ;;  %v4211_v37 = vcombine.low %v672_v26, %v676_v27  ;;  %v4030_v30 = vcombine.high %v489_v22, %v493_v23  ;;  %v561_v14 = vld [vmem:[%s6212_s2 + $0x388] sm:$0xff] }
  0x3e   : > { %v540_v33 = vld [vmem:[%s6212_s2 + $0x2e0] sm:$0xff]  ;;  %2270 = vmatpush2.bf16.msra.mxu0 %v4083_v36  ;;  %v473_v36 = vld [vmem:[%s6212_s2 + $0xc8] sm:$0xff] }
  0x3f   : > { %v664_v34 = vld [vmem:[%s6212_s2 + $0x6c0] sm:$0xff]  ;;  %v4076_v38 = vcombine.high %v536_v32, %v540_v33  ;;  %2312 = vmatprep.subr.bf16.mxu1 %v4212_v31  ;;  %v4075_v44 = vcombine.low %v536_v32, %v540_v33  ;;  %v485_v31 = vld [vmem:[%s6212_s2 + $0x128] sm:$0xff]  ;;  %v4653_v32 = vmov 0  }
  0x40   : > { %v668_v35 = vld [vmem:[%s6212_s2 + $0x6e0] sm:$0xff]  ;;  %2313 = vmatpush2.bf16.msra.mxu1 %v4211_v37  ;;  %v477_v37 = vld [vmem:[%s6212_s2 + $0xe8] sm:$0xff] }
  0x41   : > { %v4204_v39 = vcombine.high %v664_v34, %v668_v35  ;;  %v528_v40 = vld [vmem:[%s6212_s2 + $0x280] sm:$0xff]  ;;  %2271 = vmatprep.subr.bf16.mxu0 %v4076_v38  ;;  %v4203_v45 = vcombine.low %v664_v34, %v668_v35  ;;  %v4029_v34 = vcombine.low %v489_v22, %v493_v23  ;;  %v633_v38 = vld [vmem:[%s6212_s2 + $0x5c8] sm:$0xff] }
  0x42   : > { %v532_v41 = vld [vmem:[%s6212_s2 + $0x2a0] sm:$0xff]  ;;  %2272 = vmatpush2.bf16.msra.mxu0 %v4075_v44  ;;  %v465_v44 = vld [vmem:[%s6212_s2 + $0x88] sm:$0xff] }
  0x43   : > { %v656_v42 = vld [vmem:[%s6212_s2 + $0x680] sm:$0xff]  ;;  %v4068_v46 = vcombine.high %v528_v40, %v532_v41  ;;  %2314 = vmatprep.subr.bf16.mxu1 %v4204_v39  ;;  %v4067_v52 = vcombine.low %v528_v40, %v532_v41  ;;  %v637_v39 = vld [vmem:[%s6212_s2 + $0x5e8] sm:$0xff]  ;;  %v4021_v41 = vcombine.low %v481_v29, %v485_v31 }
  0x44   : > { %v660_v43 = vld [vmem:[%s6212_s2 + $0x6a0] sm:$0xff]  ;;  %2315 = vmatpush2.bf16.msra.mxu1 %v4203_v45  ;;  %v469_v45 = vld [vmem:[%s6212_s2 + $0xa8] sm:$0xff] }
  0x45   : > { %v4196_v47 = vcombine.high %v656_v42, %v660_v43  ;;  %v520_v48 = vld [vmem:[%s6212_s2 + $0x240] sm:$0xff]  ;;  %2273 = vmatprep.subr.bf16.mxu0 %v4068_v46  ;;  %v4195_v53 = vcombine.low %v656_v42, %v660_v43  ;;  %v4174_v43 = vcombine.high %v633_v38, %v637_v39  ;;  %v625_v46 = vld [vmem:[%s6212_s2 + $0x588] sm:$0xff] }
  0x46   : > { %v524_v49 = vld [vmem:[%s6212_s2 + $0x260] sm:$0xff]  ;;  %2274 = vmatpush2.bf16.msra.mxu0 %v4067_v52  ;;  %v457_v52 = vld [vmem:[%s6212_s2 + $0x48] sm:$0xff] }
  0x47   : > { %v648_v50 = vld [vmem:[%s6212_s2 + $0x640] sm:$0xff]  ;;  %v4060_v54 = vcombine.high %v520_v48, %v524_v49  ;;  %2316 = vmatprep.subr.bf16.mxu1 %v4196_v47  ;;  %v4059_v62 = vcombine.low %v520_v48, %v524_v49  ;;  %v4014_v47 = vcombine.high %v473_v36, %v477_v37  ;;  %v629_v48 = vld [vmem:[%s6212_s2 + $0x5a8] sm:$0xff]  ;;  %v4173_v49 = vcombine.low %v633_v38, %v637_v39 }
  0x48   : > { %v652_v51 = vld [vmem:[%s6212_s2 + $0x660] sm:$0xff]  ;;  %2317 = vmatpush2.bf16.msra.mxu1 %v4195_v53  ;;  %v461_v53 = vld [vmem:[%s6212_s2 + $0x68] sm:$0xff] }
  0x49   : > { %v4188_v55 = vcombine.high %v648_v50, %v652_v51  ;;  %v512_v57 = vld [vmem:[%s6212_s2 + $0x200] sm:$0xff]  ;;  %2275 = vmatprep.subr.bf16.mxu0 %v4060_v54  ;;  %v4187_v63 = vcombine.low %v648_v50, %v652_v51  ;;  %v4013_v50 = vcombine.low %v473_v36, %v477_v37  ;;  %v4166_v51 = vcombine.high %v625_v46, %v629_v48  ;;  %v617_v54 = vld [vmem:[%s6212_s2 + $0x548] sm:$0xff] }
  0x4a   : > { %v516_v58 = vld [vmem:[%s6212_s2 + $0x220] sm:$0xff]  ;;  %2276 = vmatpush2.bf16.msra.mxu0 %v4059_v62  ;;  %v449_v62 = vld [vmem:[%s6212_s2 + $0x8] sm:$0xff] }
  0x4b   : > { %v640_v60 = vld [vmem:[%s6212_s2 + $0x600] sm:$0xff]  ;;  %v4052_v0 = vcombine.high %v512_v57, %v516_v58  ;;  %2318 = vmatprep.subr.bf16.mxu1 %v4188_v55  ;;  %v4051_v6 = vcombine.low %v512_v57, %v516_v58  ;;  %v4006_v55 = vcombine.high %v465_v44, %v469_v45  ;;  %v621_v57 = vld [vmem:[%s6212_s2 + $0x568] sm:$0xff]  ;;  %v4165_v58 = vcombine.low %v625_v46, %v629_v48 }
  0x4c   : > { %v644_v61 = vld [vmem:[%s6212_s2 + $0x620] sm:$0xff]  ;;  %2319 = vmatpush2.bf16.msra.mxu1 %v4187_v63  ;;  %v453_v63 = vld [vmem:[%s6212_s2 + $0x28] sm:$0xff] }
  0x4d   : > { %v4180_v1 = vcombine.high %v640_v60, %v644_v61  ;;  %v728_v2 = vld [vmem:[%s6212_s2 + $0x8c0] sm:$0xff]  ;;  %2277 = vmatprep.subr.bf16.mxu0 %v4052_v0  ;;  %v4179_v7 = vcombine.low %v640_v60, %v644_v61  ;;  %v4005_v60 = vcombine.low %v465_v44, %v469_v45  ;;  %v4158_v61 = vcombine.high %v617_v54, %v621_v57  ;;  %v609_v0 = vld [vmem:[%s6212_s2 + $0x508] sm:$0xff] }
  0x4e   : > { %v732_v3 = vld [vmem:[%s6212_s2 + $0x8e0] sm:$0xff]  ;;  %2278 = vmatpush2.bf16.msra.mxu0 %v4051_v6  ;;  %v573_v6 = vld [vmem:[%s6212_s2 + $0x3e8] sm:$0xff] }
  0x4f   : > { %v4268_v8 = vcombine.high %v728_v2, %v732_v3  ;;  %2320 = vmatprep.subr.bf16.mxu1 %v4180_v1  ;;  %v720_v10 = vld [vmem:[%s6212_s2 + $0x880] sm:$0xff]  ;;  %v4267_v16 = vcombine.low %v728_v2, %v732_v3  ;;  %v3998_v1 = vcombine.high %v457_v52, %v461_v53  ;;  %v4157_v2 = vcombine.low %v617_v54, %v621_v57  ;;  %v553_v23 = vld [vmem:[%s6212_s2 + $0x348] sm:$0xff] }
  0x50   : > { %v724_v11 = vld [vmem:[%s6212_s2 + $0x8a0] sm:$0xff]  ;;  %2321 = vmatpush2.bf16.msra.mxu1 %v4179_v7  ;;  %v3997_v3 = vcombine.low %v457_v52, %v461_v53  ;;  %v601_v7 = vld [vmem:[%s6212_s2 + $0x4c8] sm:$0xff] }
  0x51   : > { %v4948_v12 = vld [vmem:[%s4811_s0] ss:$20 sps:$4 sm:$0xff]   ;;  %2341 = vmatprep.subr.bf16.mxu0 %v4268_v8  ;;  %v4260_v18 = vcombine.high %v720_v10, %v724_v11  ;;  %2376 = vmatprep.subr.bf16.mxu1 %v4046_v9  ;;  %v4259_v24 = vcombine.low %v720_v10, %v724_v11  ;;  %v5000_v42 = vld [vmem:[%s4811_s0 + $0x10] ss:$20 sps:$4 sm:$0xff]   ;;  %v3990_v8 = vcombine.high %v449_v62, %v453_v63  ;;  %v605_v9 = vld [vmem:[%s6212_s2 + $0x4e8] sm:$0xff] }
  0x52   : > { %v712_v20 = vld [vmem:[%s6212_s2 + $0x840] sm:$0xff]  ;;  %2280 = vmatmul.mubr.bf16.vlgmr.msra.gmra.mxu0 %v4948_v12  ;;  %v3989_v11 = vcombine.low %v449_v62, %v453_v63  ;;  %v4142_v13 = vcombine.high %v601_v7, %v605_v9  ;;  %v581_v36 = vld [vmem:[%s6212_s2 + $0x428] sm:$0xff] }
  0x53   : > { %v716_v21 = vld [vmem:[%s6212_s2 + $0x860] sm:$0xff]  ;;  %2323 = vmatmul.mubr.bf16.vlgmr.msra.gmra.mxu1 %v4957_v15  ;;  %2342 = vmatpush1.bf16.msra.mxu0 %v4267_v16  ;;  %v565_v16 = vld [vmem:[%s6212_s2 + $0x3a8] sm:$0xff] }
  0x54   : > { %2377 = vmatpush1.bf16.msra.mxu1 %v4045_v17  ;;  %2343 = vmatprep.subr.bf16.mxu0 %v4260_v18  ;;  %v4252_v26 = vcombine.high %v712_v20, %v716_v21  ;;  %v704_v27 = vld [vmem:[%s6212_s2 + $0x800] sm:$0xff]  ;;  %v4251_v33 = vcombine.low %v712_v20, %v716_v21  ;;  %v593_v17 = vld [vmem:[%s6212_s2 + $0x488] sm:$0xff]  ;;  %v4110_v18 = vcombine.high %v569_v5, %v573_v6 }
  0x55   : > { %v708_v28 = vld [vmem:[%s6212_s2 + $0x820] sm:$0xff]  ;;  %2378 = vmatprep.subr.bf16.mxu1 %v4038_v19  ;;  %2365 = vmatprep.mubr.bf16.mxu0 %v4653_v32  ;;  %v597_v19 = vld [vmem:[%s6212_s2 + $0x4a8] sm:$0xff]  ;;  %v4141_v20 = vcombine.low %v601_v7, %v605_v9  ;;  %v4109_v21 = vcombine.low %v569_v5, %v573_v6 }
  0x56   : > { %2408 = vmatprep.mubr.bf16.mxu1 %v4820_v56  ;;  %v4244_v35 = vcombine.high %v704_v27, %v708_v28  ;;  %v4022_v56 = vcombine.high %v481_v29, %v485_v31  ;;  %v4243_v40 = vcombine.low %v704_v27, %v708_v28  ;;  %v4134_v22 = vcombine.high %v593_v17, %v597_v19  ;;  %v589_v27 = vld [vmem:[%s6212_s2 + $0x468] sm:$0xff] }
  0x57   : > { %2344 = vmatpush1.bf16.msra.mxu0 %v4259_v24  ;;  %v557_v24 = vld [vmem:[%s6212_s2 + $0x368] sm:$0xff]  ;;  %v4133_v28 = vcombine.low %v593_v17, %v597_v19  ;;  %v4101_v29 = vcombine.low %v561_v14, %v565_v16 }
  0x58   : > { %2379 = vmatpush1.bf16.msra.mxu1 %v4037_v25  ;;  %2345 = vmatprep.subr.bf16.mxu0 %v4252_v26  ;;  %v585_v25 = vld [vmem:[%s6212_s2 + $0x448] sm:$0xff]  ;;  %v4102_v26 = vcombine.high %v561_v14, %v565_v16  ;;  %v4093_v38 = vcombine.low %v553_v23, %v557_v24 }
  0x59   : > { %2380 = vmatprep.subr.bf16.mxu1 %v4030_v30  ;;  %v4126_v30 = vcombine.high %v585_v25, %v589_v27  ;;  %v545_v31 = vld [vmem:[%s6212_s2 + $0x308] sm:$0xff]  ;;  %v4125_v37 = vcombine.low %v585_v25, %v589_v27 }
  0x5a   : > { %v537_v39 = vld [vmem:[%s6212_s2 + $0x2c8] sm:$0xff] }
  0x5b   : > { %2346 = vmatpush1.bf16.msra.mxu0 %v4251_v33  ;;  %v549_v33 = vld [vmem:[%s6212_s2 + $0x328] sm:$0xff] }
  0x5c   : > { %2381 = vmatpush1.bf16.msra.mxu1 %v4029_v34  ;;  %2347 = vmatprep.subr.bf16.mxu0 %v4244_v35  ;;  %v577_v34 = vld [vmem:[%s6212_s2 + $0x408] sm:$0xff]  ;;  %v4094_v35 = vcombine.high %v553_v23, %v557_v24  ;;  %v4085_v46 = vcombine.low %v545_v31, %v549_v33 }
  0x5d   : > { %2382 = vmatprep.subr.bf16.mxu1 %v4022_v56  ;;  %v4118_v56 = vcombine.high %v577_v34, %v581_v36  ;;  %v701_v44 = vld [vmem:[%s6212_s2 + $0x7e8] sm:$0xff]  ;;  %v4117_v45 = vcombine.low %v577_v34, %v581_v36 }
  0x5e   : > { %v529_v48 = vld [vmem:[%s6212_s2 + $0x288] sm:$0xff] }
  0x5f   : > { %2348 = vmatpush1.bf16.msra.mxu0 %v4243_v40  ;;  %v541_v40 = vld [vmem:[%s6212_s2 + $0x2e8] sm:$0xff] }
  0x60   : > { %2383 = vmatpush1.bf16.msra.mxu1 %v4021_v41  ;;  %2419 = vmatprep.subr.bf16.mxu0 %v4174_v43  ;;  %v697_v41 = vld [vmem:[%s6212_s2 + $0x7c8] sm:$0xff]  ;;  %v4086_v43 = vcombine.high %v545_v31, %v549_v33  ;;  %v4077_v54 = vcombine.low %v537_v39, %v541_v40 }
  0x61   : > { %2384 = vmatprep.subr.bf16.mxu1 %v4014_v47  ;;  %v4238_v47 = vcombine.high %v697_v41, %v701_v44  ;;  %v693_v52 = vld [vmem:[%s6212_s2 + $0x7a8] sm:$0xff]  ;;  %v4237_v53 = vcombine.low %v697_v41, %v701_v44  ;;  %v506_v44 = vld [vmem:[%s6212_s2 + $0x1d0] sm:$0xff] }
  0x62   : > { %4275 = vmatmul.mubr.msk.bf16.vlgmr.msra.gmra.mxu0 %vm2243_vm0, %v5000_v42  ;;  %v521_v57 = vld [vmem:[%s6212_s2 + $0x248] sm:$0xff] }
  0x63   : > { %2420 = vmatpush1.bf16.msra.mxu0 %v4173_v49  ;;  %2451 = vmatprep.mubr.bf16.mxu0 %v4829_v59  ;;  %v613_v59 = vld [vmem:[%s6212_s2 + $0x528] sm:$0xff] }
  0x64   : > { %2385 = vmatpush1.bf16.msra.mxu1 %v4013_v50  ;;  %2421 = vmatprep.subr.bf16.mxu0 %v4166_v51  ;;  %v4150_v4 = vcombine.high %v609_v0, %v613_v59  ;;  %v4149_v10 = vcombine.low %v609_v0, %v613_v59  ;;  %v533_v49 = vld [vmem:[%s6212_s2 + $0x2a8] sm:$0xff]  ;;  %v4078_v51 = vcombine.high %v537_v39, %v541_v40 }
  0x65   : > { %2386 = vmatprep.subr.bf16.mxu1 %v4006_v55  ;;  %v689_v50 = vld [vmem:[%s6212_s2 + $0x788] sm:$0xff]  ;;  %v4069_v0 = vcombine.low %v529_v48, %v533_v49 }
  0x66   : > { %v4230_v55 = vcombine.high %v689_v50, %v693_v52  ;;  %v685_v62 = vld [vmem:[%s6212_s2 + $0x768] sm:$0xff]  ;;  %v4229_v63 = vcombine.low %v689_v50, %v693_v52  ;;  %v498_v52 = vld [vmem:[%s6212_s2 + $0x190] sm:$0xff] }
  0x67   : > { %2422 = vmatpush1.bf16.msra.mxu0 %v4165_v58  ;;  %v525_v58 = vld [vmem:[%s6212_s2 + $0x268] sm:$0xff] }
  0x68   : > { %2387 = vmatpush1.bf16.msra.mxu1 %v4005_v60  ;;  %2423 = vmatprep.subr.bf16.mxu0 %v4158_v61  ;;  %v681_v60 = vld [vmem:[%s6212_s2 + $0x748] sm:$0xff]  ;;  %v4070_v61 = vcombine.high %v529_v48, %v533_v49  ;;  %v4061_v7 = vcombine.low %v521_v57, %v525_v58 }
  0x69   : > { %2388 = vmatprep.subr.bf16.mxu1 %v3998_v1  ;;  %v4222_v1 = vcombine.high %v681_v60, %v685_v62  ;;  %v513_v59 = vld [vmem:[%s6212_s2 + $0x208] sm:$0xff]  ;;  %v4221_v6 = vcombine.low %v681_v60, %v685_v62  ;;  %v490_v62 = vld [vmem:[%s6212_s2 + $0x150] sm:$0xff] }
  0x6a   : > { %v677_v5 = vld [vmem:[%s6212_s2 + $0x728] sm:$0xff] }
  0x6b   : > { %2424 = vmatpush1.bf16.msra.mxu0 %v4157_v2  ;;  %v517_v2 = vld [vmem:[%s6212_s2 + $0x228] sm:$0xff] }
  0x6c   : > { %2389 = vmatpush1.bf16.msra.mxu1 %v3997_v3  ;;  %2425 = vmatprep.subr.bf16.mxu0 %v4150_v4  ;;  %v673_v3 = vld [vmem:[%s6212_s2 + $0x708] sm:$0xff]  ;;  %v4062_v4 = vcombine.high %v521_v57, %v525_v58  ;;  %v4053_v17 = vcombine.low %v513_v59, %v517_v2 }
  0x6d   : > { %2390 = vmatprep.subr.bf16.mxu1 %v3990_v8  ;;  %v4214_v8 = vcombine.high %v673_v3, %v677_v5  ;;  %v665_v9 = vld [vmem:[%s6212_s2 + $0x6c8] sm:$0xff]  ;;  %v4213_v16 = vcombine.low %v673_v3, %v677_v5  ;;  %v486_v5 = vld [vmem:[%s6212_s2 + $0x130] sm:$0xff] }
  0x6e   : > { %v733_v14 = vld [vmem:[%s6212_s2 + $0x8e8] sm:$0xff] }
  0x6f   : > { %2426 = vmatpush1.bf16.msra.mxu0 %v4149_v10  ;;  %v669_v10 = vld [vmem:[%s6212_s2 + $0x6e8] sm:$0xff] }
  0x70   : > { %2391 = vmatpush1.bf16.msra.mxu1 %v3989_v11  ;;  %2427 = vmatprep.subr.bf16.mxu0 %v4142_v13  ;;  %v729_v11 = vld [vmem:[%s6212_s2 + $0x8c8] sm:$0xff]  ;;  %v4054_v13 = vcombine.high %v513_v59, %v517_v2  ;;  %v4205_v24 = vcombine.low %v665_v9, %v669_v10 }
  0x71   : > { %2392 = vmatprep.subr.bf16.mxu1 %v4110_v18  ;;  %v4206_v18 = vcombine.high %v665_v9, %v669_v10  ;;  %v657_v19 = vld [vmem:[%s6212_s2 + $0x688] sm:$0xff]  ;;  %v4269_v25 = vcombine.low %v729_v11, %v733_v14 }
  0x72   : > { %v725_v23 = vld [vmem:[%s6212_s2 + $0x8a8] sm:$0xff] }
  0x73   : > { %2428 = vmatpush1.bf16.msra.mxu0 %v4141_v20  ;;  %v661_v20 = vld [vmem:[%s6212_s2 + $0x6a8] sm:$0xff] }
  0x74   : > { %2393 = vmatpush2.bf16.msra.mxu1 %v4109_v21  ;;  %2429 = vmatprep.subr.bf16.mxu0 %v4134_v22  ;;  %v721_v21 = vld [vmem:[%s6212_s2 + $0x888] sm:$0xff]  ;;  %v4270_v22 = vcombine.high %v729_v11, %v733_v14  ;;  %v4197_v33 = vcombine.low %v657_v19, %v661_v20  ;;  %v474_v14 = vld [vmem:[%s6212_s2 + $0xd0] sm:$0xff] }
  0x75   : > { %2394 = vmatprep.subr.bf16.mxu1 %v4102_v26  ;;  %v4198_v26 = vcombine.high %v657_v19, %v661_v20  ;;  %v649_v27 = vld [vmem:[%s6212_s2 + $0x648] sm:$0xff]  ;;  %v4261_v34 = vcombine.low %v721_v21, %v725_v23 }
  0x76   : > { %v717_v31 = vld [vmem:[%s6212_s2 + $0x868] sm:$0xff] }
  0x77   : > { %2430 = vmatpush1.bf16.msra.mxu0 %v4133_v28  ;;  %v653_v28 = vld [vmem:[%s6212_s2 + $0x668] sm:$0xff] }
  0x78   : > { %2395 = vmatpush2.bf16.msra.mxu1 %v4101_v29  ;;  %2431 = vmatprep.subr.bf16.mxu0 %v4126_v30  ;;  %v4262_v29 = vcombine.high %v721_v21, %v725_v23  ;;  %v713_v30 = vld [vmem:[%s6212_s2 + $0x848] sm:$0xff]  ;;  %v4189_v39 = vcombine.low %v649_v27, %v653_v28  ;;  %v466_v23 = vld [vmem:[%s6212_s2 + $0x90] sm:$0xff] }
  0x79   : > { %2396 = vmatprep.subr.bf16.mxu1 %v4094_v35  ;;  %v4190_v35 = vcombine.high %v649_v27, %v653_v28  ;;  %v4254_v36 = vcombine.high %v713_v30, %v717_v31  ;;  %v4253_v40 = vcombine.low %v713_v30, %v717_v31  ;;  %v458_v31 = vld [vmem:[%s6212_s2 + $0x50] sm:$0xff] }
  0x7b   : > { %2432 = vmatpush1.bf16.msra.mxu0 %v4125_v37  ;;  %v641_v37 = vld [vmem:[%s6212_s2 + $0x608] sm:$0xff] }
  0x7c   : > { %2397 = vmatpush2.bf16.msra.mxu1 %v4093_v38  ;;  %2433 = vmatprep.subr.bf16.mxu0 %v4118_v56  ;;  %v645_v38 = vld [vmem:[%s6212_s2 + $0x628] sm:$0xff] }
  0x7d   : > { %2398 = vmatprep.subr.bf16.mxu1 %v4086_v43  ;;  %v709_v56 = vld [vmem:[%s6212_s2 + $0x828] sm:$0xff]  ;;  %v4182_v41 = vcombine.high %v641_v37, %v645_v38  ;;  %v4181_v48 = vcombine.low %v641_v37, %v645_v38 }
  0x7f   : > { %2434 = vmatpush1.bf16.msra.mxu0 %v4117_v45  ;;  %v510_v45 = vld [vmem:[%s6212_s2 + $0x1f0] sm:$0xff] }
  0x80   : > { %2399 = vmatpush2.bf16.msra.mxu1 %v4085_v46  ;;  %2435 = vmatprep.subr.bf16.mxu0 %v4238_v47  ;;  %v634_v46 = vld [vmem:[%s6212_s2 + $0x5d0] sm:$0xff]  ;;  %v4048_v50 = vcombine.high %v506_v44, %v510_v45  ;;  %v4047_v57 = vcombine.low %v506_v44, %v510_v45 }
  0x81   : > { %2400 = vmatprep.subr.bf16.mxu1 %v4078_v51  ;;  %v638_v47 = vld [vmem:[%s6212_s2 + $0x5f0] sm:$0xff] }
  0x82   : > { %v4176_v51 = vcombine.high %v634_v46, %v638_v47  ;;  %v4175_v58 = vcombine.low %v634_v46, %v638_v47  ;;  %v570_v47 = vld [vmem:[%s6212_s2 + $0x3d0] sm:$0xff] }
  0x83   : > { %2436 = vmatpush2.bf16.msra.mxu0 %v4237_v53  ;;  %v502_v53 = vld [vmem:[%s6212_s2 + $0x1b0] sm:$0xff] }
  0x84   : > { %2401 = vmatpush2.bf16.msra.mxu1 %v4077_v54  ;;  %2437 = vmatprep.subr.bf16.mxu0 %v4230_v55  ;;  %v626_v54 = vld [vmem:[%s6212_s2 + $0x590] sm:$0xff]  ;;  %v4040_v60 = vcombine.high %v498_v52, %v502_v53  ;;  %v4039_v59 = vcombine.low %v498_v52, %v502_v53 }
  0x85   : > { %2402 = vmatprep.subr.bf16.mxu1 %v4070_v61  ;;  %v630_v55 = vld [vmem:[%s6212_s2 + $0x5b0] sm:$0xff] }
  0x86   : > { %v4168_v61 = vcombine.high %v626_v54, %v630_v55  ;;  %v4167_v2 = vcombine.low %v626_v54, %v630_v55  ;;  %v562_v55 = vld [vmem:[%s6212_s2 + $0x390] sm:$0xff] }
  0x87   : > { %2438 = vmatpush2.bf16.msra.mxu0 %v4229_v63  ;;  %v494_v63 = vld [vmem:[%s6212_s2 + $0x170] sm:$0xff] }
  0x88   : > { %2403 = vmatpush2.bf16.msra.mxu1 %v4069_v0  ;;  %2439 = vmatprep.subr.bf16.mxu0 %v4222_v1  ;;  %v618_v0 = vld [vmem:[%s6212_s2 + $0x550] sm:$0xff]  ;;  %v4032_v3 = vcombine.high %v490_v62, %v494_v63  ;;  %v4031_v9 = vcombine.low %v490_v62, %v494_v63 }
  0x89   : > { %2404 = vmatprep.subr.bf16.mxu1 %v4062_v4  ;;  %v622_v1 = vld [vmem:[%s6212_s2 + $0x570] sm:$0xff] }
  0x8a   : > { %v482_v4 = vld [vmem:[%s6212_s2 + $0x110] sm:$0xff]  ;;  %v4159_v10 = vcombine.low %v618_v0, %v622_v1 }
  0x8b   : > { %2440 = vmatpush2.bf16.msra.mxu0 %v4221_v6  ;;  %v5233_v6 = vld [vmem:[%s4811_s0 + $0x4] ss:$20 sps:$4 sm:$0xff]   ;;  %v4024_v11 = vcombine.high %v482_v4, %v486_v5  ;;  %v4023_v19 = vcombine.low %v482_v4, %v486_v5 }
  0x8c   : > { %2405 = vmatpush2.bf16.msra.mxu1 %v4061_v7  ;;  %2441 = vmatprep.subr.bf16.mxu0 %v4214_v8  ;;  %v614_v7 = vld [vmem:[%s6212_s2 + $0x530] sm:$0xff]  ;;  %v5243_v8 = vld [vmem:[%s4811_s0 + $0xc] ss:$20 sps:$4 sm:$0xff]  }
  0x8d   : > { %2406 = vmatprep.subr.bf16.mxu1 %v4054_v13 }
  0x8f   : > { %2442 = vmatpush2.bf16.msra.mxu0 %v4213_v16  ;;  %v478_v16 = vld [vmem:[%s6212_s2 + $0xf0] sm:$0xff] }
  0x90   : > { %2407 = vmatpush2.bf16.msra.mxu1 %v4053_v17  ;;  %2443 = vmatprep.subr.bf16.mxu0 %v4206_v18  ;;  %v602_v17 = vld [vmem:[%s6212_s2 + $0x4d0] sm:$0xff]  ;;  %v4016_v21 = vcombine.high %v474_v14, %v478_v16  ;;  %v4015_v27 = vcombine.low %v474_v14, %v478_v16 }
  0x91   : > { %2470 = vmatprep.subr.bf16.mxu1 %v4270_v22  ;;  %v606_v18 = vld [vmem:[%s6212_s2 + $0x4f0] sm:$0xff] }
  0x92   : > { %v4144_v22 = vcombine.high %v602_v17, %v606_v18  ;;  %v4143_v28 = vcombine.low %v602_v17, %v606_v18  ;;  %v538_v18 = vld [vmem:[%s6212_s2 + $0x2d0] sm:$0xff] }
  0x93   : > { %2409 = vmatmul.mubr.bf16.vlgmr.msra.gmra.mxu1 %v4948_v12  ;;  %2444 = vmatpush2.bf16.msra.mxu0 %v4205_v24  ;;  %v705_v12 = vld [vmem:[%s6212_s2 + $0x808] sm:$0xff]  ;;  %v470_v24 = vld [vmem:[%s6212_s2 + $0xb0] sm:$0xff] }
  0x94   : > { %2471 = vmatpush1.bf16.msra.mxu1 %v4269_v25  ;;  %2445 = vmatprep.subr.bf16.mxu0 %v4198_v26  ;;  %v4246_v43 = vcombine.high %v705_v12, %v709_v56  ;;  %v4245_v49 = vcombine.low %v705_v12, %v709_v56  ;;  %v594_v25 = vld [vmem:[%s6212_s2 + $0x490] sm:$0xff] }
  0x95   : > { %2472 = vmatprep.subr.bf16.mxu1 %v4262_v29  ;;  %2494 = vmatprep.mubr.bf16.mxu1 %v4653_v32  ;;  %v598_v26 = vld [vmem:[%s6212_s2 + $0x4b0] sm:$0xff]  ;;  %v4008_v29 = vcombine.high %v466_v23, %v470_v24 }
  0x96   : > { %v4136_v30 = vcombine.high %v594_v25, %v598_v26  ;;  %v4135_v37 = vcombine.low %v594_v25, %v598_v26  ;;  %v450_v56 = vld [vmem:[%s6212_s2 + $0x10] sm:$0xff] }
  0x97   : > { %2446 = vmatpush2.bf16.msra.mxu0 %v4197_v33  ;;  %v462_v33 = vld [vmem:[%s6212_s2 + $0x70] sm:$0xff] }
  0x98   : > { %2473 = vmatpush1.bf16.msra.mxu1 %v4261_v34  ;;  %2447 = vmatprep.subr.bf16.mxu0 %v4190_v35  ;;  %v586_v34 = vld [vmem:[%s6212_s2 + $0x450] sm:$0xff]  ;;  %v4000_v38 = vcombine.high %v458_v31, %v462_v33 }
  0x99   : > { %2474 = vmatprep.subr.bf16.mxu1 %v4254_v36  ;;  %v590_v35 = vld [vmem:[%s6212_s2 + $0x470] sm:$0xff]  ;;  %v4007_v36 = vcombine.low %v466_v23, %v470_v24 }
  0x9a   : > { %v4128_v12 = vcombine.high %v586_v34, %v590_v35  ;;  %v4127_v44 = vcombine.low %v586_v34, %v590_v35  ;;  %v530_v26 = vld [vmem:[%s6212_s2 + $0x290] sm:$0xff] }
  0x9b   : > { %2448 = vmatpush2.bf16.msra.mxu0 %v4189_v39  ;;  %v454_v39 = vld [vmem:[%s6212_s2 + $0x30] sm:$0xff] }
  0x9c   : > { %2475 = vmatpush1.bf16.msra.mxu1 %v4253_v40  ;;  %2449 = vmatprep.subr.bf16.mxu0 %v4182_v41  ;;  %v578_v40 = vld [vmem:[%s6212_s2 + $0x410] sm:$0xff]  ;;  %v3992_v45 = vcombine.high %v450_v56, %v454_v39 }
  0x9d   : > { %2476 = vmatprep.subr.bf16.mxu1 %v4246_v43  ;;  %v582_v41 = vld [vmem:[%s6212_s2 + $0x430] sm:$0xff]  ;;  %v3999_v43 = vcombine.low %v458_v31, %v462_v33 }
  0x9e   : > { %v4120_v46 = vcombine.high %v578_v40, %v582_v41  ;;  %v4119_v52 = vcombine.low %v578_v40, %v582_v41  ;;  %v522_v35 = vld [vmem:[%s6212_s2 + $0x250] sm:$0xff] }
  0x9f   : > { %2450 = vmatpush2.bf16.msra.mxu0 %v4181_v48  ;;  %v574_v48 = vld [vmem:[%s6212_s2 + $0x3f0] sm:$0xff] }
  0xa0   : > { %2477 = vmatpush1.bf16.msra.mxu1 %v4245_v49  ;;  %2505 = vmatprep.subr.bf16.mxu0 %v4048_v50  ;;  %v698_v49 = vld [vmem:[%s6212_s2 + $0x7d0] sm:$0xff]  ;;  %v4112_v53 = vcombine.high %v570_v47, %v574_v48 }
  0xa1   : > { %2548 = vmatprep.subr.bf16.mxu1 %v4176_v51  ;;  %v702_v50 = vld [vmem:[%s6212_s2 + $0x7f0] sm:$0xff]  ;;  %v3991_v51 = vcombine.low %v450_v56, %v454_v39 }
  0xa2   : > { %2452 = vmatmul.mubr.bf16.vlgmr.msra.gmra.mxu0 %v4957_v15  ;;  %v4160_v15 = vcombine.high %v618_v0, %v622_v1  ;;  %v4240_v54 = vcombine.high %v698_v49, %v702_v50  ;;  %v4239_v62 = vcombine.low %v698_v49, %v702_v50  ;;  %v554_v1 = vld [vmem:[%s6212_s2 + $0x350] sm:$0xff] }
  0xa3   : > { %4276 = vmatmul.mubr.msk.bf16.vlgmr.msra.gmra.mxu1 %vm2243_vm0, %v5000_v42  ;;  %2506 = vmatpush1.bf16.msra.mxu0 %v4047_v57  ;;  %v610_v42 = vld [vmem:[%s6212_s2 + $0x510] sm:$0xff] }
  0xa4   : > { %2549 = vmatpush1.bf16.msra.mxu1 %v4175_v58  ;;  %2507 = vmatprep.subr.bf16.mxu0 %v4040_v60  ;;  %v4152_v13 = vcombine.high %v610_v42, %v614_v7  ;;  %v4151_v20 = vcombine.low %v610_v42, %v614_v7  ;;  %v566_v57 = vld [vmem:[%s6212_s2 + $0x3b0] sm:$0xff] }
  0xa5   : > { %2550 = vmatprep.subr.bf16.mxu1 %v4168_v61  ;;  %2537 = vmatprep.mubr.bf16.mxu0 %v5233_v6  ;;  %v690_v58 = vld [vmem:[%s6212_s2 + $0x790] sm:$0xff]  ;;  %v4111_v61 = vcombine.low %v570_v47, %v574_v48  ;;  %v4104_v63 = vcombine.high %v562_v55, %v566_v57 }
  0xa6   : > { %2580 = vmatprep.mubr.bf16.mxu1 %v5243_v8  ;;  %v694_v60 = vld [vmem:[%s6212_s2 + $0x7b0] sm:$0xff] }
  0xa7   : > { %2508 = vmatpush1.bf16.msra.mxu0 %v4039_v59  ;;  %v4232_v0 = vcombine.high %v690_v58, %v694_v60  ;;  %v558_v59 = vld [vmem:[%s6212_s2 + $0x370] sm:$0xff]  ;;  %v4231_v4 = vcombine.low %v690_v58, %v694_v60 }
  0xa8   : > { %2551 = vmatpush1.bf16.msra.mxu1 %v4167_v2  ;;  %2509 = vmatprep.subr.bf16.mxu0 %v4032_v3  ;;  %v682_v2 = vld [vmem:[%s6212_s2 + $0x750] sm:$0xff]  ;;  %v4096_v5 = vcombine.high %v554_v1, %v558_v59 }
  0xa9   : > { %2552 = vmatprep.subr.bf16.mxu1 %v4160_v15  ;;  %v686_v3 = vld [vmem:[%s6212_s2 + $0x770] sm:$0xff]  ;;  %v4103_v15 = vcombine.low %v562_v55, %v566_v57 }
  0xaa   : > { %v4224_v42 = vcombine.high %v682_v2, %v686_v3  ;;  %v546_v7 = vld [vmem:[%s6212_s2 + $0x310] sm:$0xff]  ;;  %v4223_v14 = vcombine.low %v682_v2, %v686_v3 }
  0xab   : > { %2510 = vmatpush1.bf16.msra.mxu0 %v4031_v9  ;;  %v550_v9 = vld [vmem:[%s6212_s2 + $0x330] sm:$0xff] }
  0xac   : > { %2553 = vmatpush1.bf16.msra.mxu1 %v4159_v10  ;;  %2511 = vmatprep.subr.bf16.mxu0 %v4024_v11  ;;  %v674_v10 = vld [vmem:[%s6212_s2 + $0x710] sm:$0xff]  ;;  %v4088_v16 = vcombine.high %v546_v7, %v550_v9 }
  0xad   : > { %2554 = vmatprep.subr.bf16.mxu1 %v4152_v13  ;;  %v678_v11 = vld [vmem:[%s6212_s2 + $0x730] sm:$0xff]  ;;  %v4095_v13 = vcombine.low %v554_v1, %v558_v59 }
  0xae   : > { %v4216_v17 = vcombine.high %v674_v10, %v678_v11  ;;  %v4215_v23 = vcombine.low %v674_v10, %v678_v11  ;;  %v514_v41 = vld [vmem:[%s6212_s2 + $0x210] sm:$0xff] }
  0xaf   : > { %2512 = vmatpush1.bf16.msra.mxu0 %v4023_v19  ;;  %v542_v19 = vld [vmem:[%s6212_s2 + $0x2f0] sm:$0xff] }
  0xb0   : > { %2555 = vmatpush1.bf16.msra.mxu1 %v4151_v20  ;;  %2513 = vmatprep.subr.bf16.mxu0 %v4016_v21  ;;  %v666_v20 = vld [vmem:[%s6212_s2 + $0x6d0] sm:$0xff]  ;;  %v4080_v24 = vcombine.high %v538_v18, %v542_v19 }
  0xb1   : > { %2556 = vmatprep.subr.bf16.mxu1 %v4144_v22  ;;  %v670_v21 = vld [vmem:[%s6212_s2 + $0x6f0] sm:$0xff]  ;;  %v4087_v22 = vcombine.low %v546_v7, %v550_v9  ;;  %v5431_v7 = vld [vmem:[%s4811_s0 + $0x8] ss:$20 sps:$4 sm:$0xff]  }
  0xb2   : > { %v4208_v25 = vcombine.high %v666_v20, %v670_v21  ;;  %v4207_v31 = vcombine.low %v666_v20, %v670_v21  ;;  %v730_v50 = vld [vmem:[%s6212_s2 + $0x8d0] sm:$0xff] }
  0xb3   : > { %2514 = vmatpush1.bf16.msra.mxu0 %v4015_v27  ;;  %v534_v27 = vld [vmem:[%s6212_s2 + $0x2b0] sm:$0xff] }
  0xb4   : > { %2557 = vmatpush1.bf16.msra.mxu1 %v4143_v28  ;;  %2515 = vmatprep.subr.bf16.mxu0 %v4008_v29  ;;  %v658_v28 = vld [vmem:[%s6212_s2 + $0x690] sm:$0xff]  ;;  %v4072_v33 = vcombine.high %v530_v26, %v534_v27 }
  0xb5   : > { %2558 = vmatprep.subr.bf16.mxu1 %v4136_v30  ;;  %v662_v29 = vld [vmem:[%s6212_s2 + $0x6b0] sm:$0xff]  ;;  %v4079_v30 = vcombine.low %v538_v18, %v542_v19  ;;  %v487_v18 = vld [vmem:[%s6212_s2 + $0x138] sm:$0xff] }
  0xb6   : > { %v4200_v34 = vcombine.high %v658_v28, %v662_v29  ;;  %v4199_v56 = vcombine.low %v658_v28, %v662_v29  ;;  %v722_v60 = vld [vmem:[%s6212_s2 + $0x890] sm:$0xff] }
  0xb7   : > { %2516 = vmatpush1.bf16.msra.mxu0 %v4007_v36  ;;  %v526_v36 = vld [vmem:[%s6212_s2 + $0x270] sm:$0xff] }
  0xb8   : > { %2559 = vmatpush1.bf16.msra.mxu1 %v4135_v37  ;;  %2517 = vmatprep.subr.bf16.mxu0 %v4000_v38  ;;  %v650_v37 = vld [vmem:[%s6212_s2 + $0x650] sm:$0xff]  ;;  %v4064_v39 = vcombine.high %v522_v35, %v526_v36 }
  0xb9   : > { %2560 = vmatprep.subr.bf16.mxu1 %v4128_v12  ;;  %v654_v38 = vld [vmem:[%s6212_s2 + $0x670] sm:$0xff]  ;;  %v4071_v12 = vcombine.low %v530_v26, %v534_v27 }
  0xba   : > { %v4192_v40 = vcombine.high %v650_v37, %v654_v38  ;;  %v4191_v47 = vcombine.low %v650_v37, %v654_v38  ;;  %v714_v3 = vld [vmem:[%s6212_s2 + $0x850] sm:$0xff] }
  0xbb   : > { %2518 = vmatpush1.bf16.msra.mxu0 %v3999_v43  ;;  %v518_v43 = vld [vmem:[%s6212_s2 + $0x230] sm:$0xff] }
  0xbc   : > { %2561 = vmatpush1.bf16.msra.mxu1 %v4127_v44  ;;  %2519 = vmatprep.subr.bf16.mxu0 %v3992_v45  ;;  %v642_v44 = vld [vmem:[%s6212_s2 + $0x610] sm:$0xff]  ;;  %v4056_v48 = vcombine.high %v514_v41, %v518_v43 }
  0xbd   : > { %2562 = vmatprep.subr.bf16.mxu1 %v4120_v46  ;;  %v646_v45 = vld [vmem:[%s6212_s2 + $0x630] sm:$0xff]  ;;  %v4063_v46 = vcombine.low %v522_v35, %v526_v36 }
  0xbe   : > { %v4184_v49 = vcombine.high %v642_v44, %v646_v45  ;;  %v4183_v55 = vcombine.low %v642_v44, %v646_v45 }
  0xbf   : > { %2520 = vmatpush1.bf16.msra.mxu0 %v3991_v51  ;;  %v734_v51 = vld [vmem:[%s6212_s2 + $0x8f0] sm:$0xff] }
  0xc0   : > { %2563 = vmatpush1.bf16.msra.mxu1 %v4119_v52  ;;  %2521 = vmatprep.subr.bf16.mxu0 %v4112_v53  ;;  %v507_v52 = vld [vmem:[%s6212_s2 + $0x1d8] sm:$0xff]  ;;  %v4272_v57 = vcombine.high %v730_v50, %v734_v51 }
  0xc1   : > { %2564 = vmatprep.subr.bf16.mxu1 %v4240_v54  ;;  %v511_v53 = vld [vmem:[%s6212_s2 + $0x1f8] sm:$0xff]  ;;  %v4055_v54 = vcombine.low %v514_v41, %v518_v43 }
  0xc2   : > { %v4050_v58 = vcombine.high %v507_v52, %v511_v53  ;;  %v4049_v1 = vcombine.low %v507_v52, %v511_v53  ;;  %v463_v41 = vld [vmem:[%s6212_s2 + $0x78] sm:$0xff] }
  0xc3   : > { %2522 = vmatpush2.bf16.msra.mxu0 %v4111_v61  ;;  %v726_v61 = vld [vmem:[%s6212_s2 + $0x8b0] sm:$0xff] }
  0xc4   : > { %2565 = vmatpush2.bf16.msra.mxu1 %v4239_v62  ;;  %2523 = vmatprep.subr.bf16.mxu0 %v4104_v63  ;;  %v499_v62 = vld [vmem:[%s6212_s2 + $0x198] sm:$0xff]  ;;  %v4264_v59 = vcombine.high %v722_v60, %v726_v61  ;;  %v4263_v9 = vcombine.low %v722_v60, %v726_v61 }
  0xc5   : > { %2566 = vmatprep.subr.bf16.mxu1 %v4232_v0  ;;  %v503_v63 = vld [vmem:[%s6212_s2 + $0x1b8] sm:$0xff]  ;;  %v4271_v0 = vcombine.low %v730_v50, %v734_v51 }
  0xc6   : > { %v4042_v2 = vcombine.high %v499_v62, %v503_v63  ;;  %v4041_v10 = vcombine.low %v499_v62, %v503_v63 }
  0xc7   : > { %2524 = vmatpush2.bf16.msra.mxu0 %v4103_v15  ;;  %v718_v15 = vld [vmem:[%s6212_s2 + $0x870] sm:$0xff] }
  0xc8   : > { %2567 = vmatpush2.bf16.msra.mxu1 %v4231_v4  ;;  %2525 = vmatprep.subr.bf16.mxu0 %v4096_v5  ;;  %v5421_v4 = vld [vmem:[%s4811_s0] ss:$20 sps:$4 sm:$0xff]   ;;  %v491_v5 = vld [vmem:[%s6212_s2 + $0x158] sm:$0xff]  ;;  %v4256_v11 = vcombine.high %v714_v3, %v718_v15  ;;  %v4255_v19 = vcombine.low %v714_v3, %v718_v15 }
  0xc9   : > { %2568 = vmatprep.subr.bf16.mxu1 %v4224_v42  ;;  %v495_v42 = vld [vmem:[%s6212_s2 + $0x178] sm:$0xff] }
  0xca   : > { %v4033_v20 = vcombine.low %v491_v5, %v495_v42 }
  0xcb   : > { %2526 = vmatpush2.bf16.msra.mxu0 %v4095_v13  ;;  %v4034_v13 = vcombine.high %v491_v5, %v495_v42 }
  0xcc   : > { %2569 = vmatpush2.bf16.msra.mxu1 %v4223_v14  ;;  %2527 = vmatprep.subr.bf16.mxu0 %v4088_v16  ;;  %v706_v14 = vld [vmem:[%s6212_s2 + $0x810] sm:$0xff] }
  0xcd   : > { %2570 = vmatprep.subr.bf16.mxu1 %v4216_v17  ;;  %v710_v16 = vld [vmem:[%s6212_s2 + $0x830] sm:$0xff]  ;;  %v483_v17 = vld [vmem:[%s6212_s2 + $0x118] sm:$0xff] }
  0xce   : > { %v4248_v21 = vcombine.high %v706_v14, %v710_v16  ;;  %v4247_v26 = vcombine.low %v706_v14, %v710_v16  ;;  %v4025_v27 = vcombine.low %v483_v17, %v487_v18  ;;  %v738_v16 = vlaneseq }
  0xcf   : > { %2528 = vmatpush2.bf16.msra.mxu0 %v4087_v22  ;;  %v4026_v22 = vcombine.high %v483_v17, %v487_v18 }
  0xd0   : > { %2571 = vmatpush2.bf16.msra.mxu1 %v4215_v23  ;;  %2529 = vmatprep.subr.bf16.mxu0 %v4080_v24  ;;  %v635_v23 = vld [vmem:[%s6212_s2 + $0x5d8] sm:$0xff] }
  0xd1   : > { %2572 = vmatprep.subr.bf16.mxu1 %v4208_v25  ;;  %v639_v24 = vld [vmem:[%s6212_s2 + $0x5f8] sm:$0xff] }
  0xd2   : > { %v479_v25 = vld [vmem:[%s6212_s2 + $0xf8] sm:$0xff]  ;;  %v4178_v28 = vcombine.high %v635_v23, %v639_v24  ;;  %v4177_v35 = vcombine.low %v635_v23, %v639_v24 }
  0xd3   : > { %2530 = vmatpush2.bf16.msra.mxu0 %v4079_v30  ;;  %v627_v30 = vld [vmem:[%s6212_s2 + $0x598] sm:$0xff] }
  0xd4   : > { %2573 = vmatpush2.bf16.msra.mxu1 %v4207_v31  ;;  %2531 = vmatprep.subr.bf16.mxu0 %v4072_v33  ;;  %v631_v31 = vld [vmem:[%s6212_s2 + $0x5b8] sm:$0xff] }
  0xd5   : > { %2574 = vmatprep.subr.bf16.mxu1 %v4200_v34  ;;  %v467_v33 = vld [vmem:[%s6212_s2 + $0x98] sm:$0xff]  ;;  %v4170_v37 = vcombine.high %v627_v30, %v631_v31  ;;  %v4169_v43 = vcombine.low %v627_v30, %v631_v31 }
  0xd6   : > { %v471_v34 = vld [vmem:[%s6212_s2 + $0xb8] sm:$0xff] }
  0xd7   : > { %2532 = vmatpush2.bf16.msra.mxu0 %v4071_v12  ;;  %v4010_v38 = vcombine.high %v467_v33, %v471_v34  ;;  %v619_v12 = vld [vmem:[%s6212_s2 + $0x558] sm:$0xff]  ;;  %v4009_v44 = vcombine.low %v467_v33, %v471_v34 }
  0xd8   : > { %2575 = vmatpush2.bf16.msra.mxu1 %v4199_v56  ;;  %2533 = vmatprep.subr.bf16.mxu0 %v4064_v39  ;;  %v623_v56 = vld [vmem:[%s6212_s2 + $0x578] sm:$0xff]  ;;  %v5479_v39 = vld [vmem:[%s4811_s0 + $0x10] ss:$20 sps:$4 sm:$0xff]  }
  0xd9   : > { %2576 = vmatprep.subr.bf16.mxu1 %v4192_v40  ;;  %v459_v40 = vld [vmem:[%s6212_s2 + $0x58] sm:$0xff]  ;;  %v4162_v45 = vcombine.high %v619_v12, %v623_v56  ;;  %v4161_v50 = vcombine.low %v619_v12, %v623_v56 }
  0xda   : > { %v4001_v51 = vcombine.low %v459_v40, %v463_v41  ;;  %v551_v23 = vld [vmem:[%s6212_s2 + $0x338] sm:$0xff] }
  0xdb   : > { %2534 = vmatpush2.bf16.msra.mxu0 %v4063_v46  ;;  %v4002_v46 = vcombine.high %v459_v40, %v463_v41  ;;  %v539_v30 = vld [vmem:[%s6212_s2 + $0x2d8] sm:$0xff] }
  0xdc   : > { %2577 = vmatpush2.bf16.msra.mxu1 %v4191_v47  ;;  %2535 = vmatprep.subr.bf16.mxu0 %v4056_v48  ;;  %v611_v47 = vld [vmem:[%s6212_s2 + $0x518] sm:$0xff] }
  0xdd   : > { %2578 = vmatprep.subr.bf16.mxu1 %v4184_v49  ;;  %v615_v48 = vld [vmem:[%s6212_s2 + $0x538] sm:$0xff] }
  0xde   : > { %v451_v49 = vld [vmem:[%s6212_s2 + $0x18] sm:$0xff]  ;;  %v4154_v52 = vcombine.high %v611_v47, %v615_v48  ;;  %v4153_v60 = vcombine.low %v611_v47, %v615_v48 }
  0xdf   : > { %2536 = vmatpush2.bf16.msra.mxu0 %v4055_v54  ;;  %v603_v54 = vld [vmem:[%s6212_s2 + $0x4d8] sm:$0xff] }
  0xe0   : > { %2579 = vmatpush2.bf16.msra.mxu1 %v4183_v55  ;;  %2599 = vmatprep.subr.bf16.mxu0 %v4272_v57  ;;  %v607_v55 = vld [vmem:[%s6212_s2 + $0x4f8] sm:$0xff] }
  0xe1   : > { %2634 = vmatprep.subr.bf16.mxu1 %v4050_v58  ;;  %v571_v57 = vld [vmem:[%s6212_s2 + $0x3d8] sm:$0xff]  ;;  %v4146_v62 = vcombine.high %v603_v54, %v607_v55  ;;  %v4145_v3 = vcombine.low %v603_v54, %v607_v55 }
  0xe2   : > { %2538 = vmatmul.mubr.bf16.vlgmr.msra.gmra.mxu0 %v5421_v4  ;;  %v575_v58 = vld [vmem:[%s6212_s2 + $0x3f8] sm:$0xff] }
  0xe3   : > { %2581 = vmatmul.mubr.bf16.vlgmr.msra.gmra.mxu1 %v5431_v7  ;;  %2600 = vmatpush1.bf16.msra.mxu0 %v4271_v0  ;;  %v4114_v63 = vcombine.high %v571_v57, %v575_v58  ;;  %v595_v0 = vld [vmem:[%s6212_s2 + $0x498] sm:$0xff]  ;;  %v4113_v15 = vcombine.low %v571_v57, %v575_v58 }
  0xe4   : > { %2635 = vmatpush1.bf16.msra.mxu1 %v4049_v1  ;;  %2601 = vmatprep.subr.bf16.mxu0 %v4264_v59  ;;  %v599_v1 = vld [vmem:[%s6212_s2 + $0x4b8] sm:$0xff] }
  0xe5   : > { %2636 = vmatprep.subr.bf16.mxu1 %v4042_v2  ;;  %2623 = vmatprep.mubr.bf16.mxu0 %v4653_v32  ;;  %v563_v59 = vld [vmem:[%s6212_s2 + $0x398] sm:$0xff]  ;;  %v4138_v5 = vcombine.high %v595_v0, %v599_v1  ;;  %v4137_v14 = vcombine.low %v595_v0, %v599_v1 }
  0xe6   : > { %2666 = vmatprep.mubr.bf16.mxu1 %v5233_v6  ;;  %v475_v6 = vld [vmem:[%s6212_s2 + $0xd8] sm:$0xff] }
  0xe7   : > { %2602 = vmatpush1.bf16.msra.mxu0 %v4263_v9  ;;  %v4018_v29 = vcombine.high %v475_v6, %v479_v25  ;;  %v4017_v36 = vcombine.low %v475_v6, %v479_v25  ;;  %v567_v2 = vld [vmem:[%s6212_s2 + $0x3b8] sm:$0xff]  ;;  %v5550_v6 = vshrl.u32 %v738_v16, 7 }
  0xe8   : > { %2637 = vmatpush1.bf16.msra.mxu1 %v4041_v10  ;;  %2603 = vmatprep.subr.bf16.mxu0 %v4256_v11  ;;  %v4106_v42 = vcombine.high %v563_v59, %v567_v2  ;;  %v587_v9 = vld [vmem:[%s6212_s2 + $0x458] sm:$0xff]  ;;  %v4105_v17 = vcombine.low %v563_v59, %v567_v2 }
  0xe9   : > { %2638 = vmatprep.subr.bf16.mxu1 %v4034_v13  ;;  %v591_v10 = vld [vmem:[%s6212_s2 + $0x478] sm:$0xff]  ;;  %v740_v34 = vsub.s32 0, %v5550_v6 }
  0xea   : > { %v555_v11 = vld [vmem:[%s6212_s2 + $0x358] sm:$0xff]  ;;  %v4130_v18 = vcombine.high %v587_v9, %v591_v10  ;;  %v4129_v24 = vcombine.low %v587_v9, %v591_v10 }
  0xeb   : > { %2604 = vmatpush1.bf16.msra.mxu0 %v4255_v19  ;;  %v559_v13 = vld [vmem:[%s6212_s2 + $0x378] sm:$0xff] }
  0xec   : > { %2639 = vmatpush1.bf16.msra.mxu1 %v4033_v20  ;;  %2605 = vmatprep.subr.bf16.mxu0 %v4248_v21  ;;  %v4098_v19 = vcombine.high %v555_v11, %v559_v13  ;;  %v579_v20 = vld [vmem:[%s6212_s2 + $0x418] sm:$0xff]  ;;  %v4097_v25 = vcombine.low %v555_v11, %v559_v13 }
  0xed   : > { %2640 = vmatprep.subr.bf16.mxu1 %v4026_v22  ;;  %v583_v21 = vld [vmem:[%s6212_s2 + $0x438] sm:$0xff] }
  0xee   : > { %v547_v22 = vld [vmem:[%s6212_s2 + $0x318] sm:$0xff]  ;;  %v4121_v33 = vcombine.low %v579_v20, %v583_v21 }
  0xef   : > { %2606 = vmatpush1.bf16.msra.mxu0 %v4247_v26  ;;  %v4122_v26 = vcombine.high %v579_v20, %v583_v21  ;;  %v543_v31 = vld [vmem:[%s6212_s2 + $0x2f8] sm:$0xff] }
  0xf0   : > { %2641 = vmatpush1.bf16.msra.mxu1 %v4025_v27  ;;  %2677 = vmatprep.subr.bf16.mxu0 %v4178_v28  ;;  %v4090_v27 = vcombine.high %v547_v22, %v551_v23  ;;  %v699_v28 = vld [vmem:[%s6212_s2 + $0x7d8] sm:$0xff] }
  0xf1   : > { %2642 = vmatprep.subr.bf16.mxu1 %v4018_v29  ;;  %v703_v29 = vld [vmem:[%s6212_s2 + $0x7f8] sm:$0xff] }
  0xf2   : > { %4277 = vmatmul.mubr.msk.bf16.vlgmr.msra.gmra.mxu0 %vm2243_vm0, %v5479_v39  ;;  %v691_v12 = vld [vmem:[%s6212_s2 + $0x798] sm:$0xff] }
  0xf3   : > { %2678 = vmatpush1.bf16.msra.mxu0 %v4177_v35  ;;  %2709 = vmatprep.mubr.bf16.mxu0 %v5243_v8  ;;  %v455_v8 = vld [vmem:[%s6212_s2 + $0x38] sm:$0xff]  ;;  %v4089_v35 = vcombine.low %v547_v22, %v551_v23 }
  0xf4   : > { %2643 = vmatpush1.bf16.msra.mxu1 %v4017_v36  ;;  %2679 = vmatprep.subr.bf16.mxu0 %v4170_v37  ;;  %v3994_v53 = vcombine.high %v451_v49, %v455_v8  ;;  %v3993_v61 = vcombine.low %v451_v49, %v455_v8  ;;  %v5568_v36 = vld [vmem:[%s6213_s3] sm:$0xff]  ;;  %v4242_v37 = vcombine.high %v699_v28, %v703_v29  ;;  %v695_v56 = vld [vmem:[%s6212_s2 + $0x7b8] sm:$0xff] }
  0xf5   : > { %2644 = vmatprep.subr.bf16.mxu1 %v4010_v38  ;;  %v4082_v38 = vcombine.high %v539_v30, %v543_v31  ;;  %v531_v40 = vld [vmem:[%s6212_s2 + $0x298] sm:$0xff]  ;;  %v4233_v54 = vcombine.low %v691_v12, %v695_v56 }
  0xf6   : > { %v535_v41 = vld [vmem:[%s6212_s2 + $0x2b8] sm:$0xff] }
  0xf7   : > { %2680 = vmatpush1.bf16.msra.mxu0 %v4169_v43  ;;  %v741_v43 = vrot.slane %v5568_v36, %v740_v34  ;;  %v4074_v47 = vcombine.high %v531_v40, %v535_v41  ;;  %v683_v48 = vld [vmem:[%s6212_s2 + $0x758] sm:$0xff]  ;;  %v4073_v57 = vcombine.low %v531_v40, %v535_v41 }
  0xf8   : > { %2645 = vmatpush1.bf16.msra.mxu1 %v4009_v44  ;;  %2681 = vmatprep.subr.bf16.mxu0 %v4162_v45  ;;  %v4241_v44 = vcombine.low %v699_v28, %v703_v29  ;;  %v4081_v45 = vcombine.low %v539_v30, %v543_v31  ;;  %v687_v49 = vld [vmem:[%s6212_s2 + $0x778] sm:$0xff] }
  0xf9   : > { %2646 = vmatprep.subr.bf16.mxu1 %v4002_v46  ;;  %v4234_v46 = vcombine.high %v691_v12, %v695_v56  ;;  %v4226_v58 = vcombine.high %v683_v48, %v687_v49  ;;  %v679_v0 = vld [vmem:[%s6212_s2 + $0x738] sm:$0xff] }
  0xfa   : > { %v515_v59 = vld [vmem:[%s6212_s2 + $0x218] sm:$0xff] }
  0xfb   : > { %2682 = vmatpush1.bf16.msra.mxu0 %v4161_v50  ;;  %v523_v50 = vld [vmem:[%s6212_s2 + $0x258] sm:$0xff] }
  0xfc   : > { %2647 = vmatpush1.bf16.msra.mxu1 %v4001_v51  ;;  %2683 = vmatprep.subr.bf16.mxu0 %v4154_v52  ;;  %v527_v51 = vld [vmem:[%s6212_s2 + $0x278] sm:$0xff] }
  0xfd   : > { %2648 = vmatprep.subr.bf16.mxu1 %v3994_v53  ;;  %v519_v2 = vld [vmem:[%s6212_s2 + $0x238] sm:$0xff] }
  0xfe   : > { %v4058_v11 = vcombine.high %v515_v59, %v519_v2  ;;  %v667_v13 = vld [vmem:[%s6212_s2 + $0x6d8] sm:$0xff] }
  0xff   : > { %2684 = vmatpush1.bf16.msra.mxu0 %v4153_v60  ;;  %v731_v16 = vld [vmem:[%s6212_s2 + $0x8d8] sm:$0xff] }
 0x100   : > { %2649 = vmatpush1.bf16.msra.mxu1 %v3993_v61  ;;  %2685 = vmatprep.subr.bf16.mxu0 %v4146_v62  ;;  %v4066_v62 = vcombine.high %v523_v50, %v527_v51  ;;  %v659_v22 = vld [vmem:[%s6212_s2 + $0x698] sm:$0xff] }
 0x101   : > { %2650 = vmatprep.subr.bf16.mxu1 %v4114_v63  ;;  %v675_v63 = vld [vmem:[%s6212_s2 + $0x718] sm:$0xff] }
 0x102   : > { %v4218_v9 = vcombine.high %v675_v63, %v679_v0  ;;  %v663_v23 = vld [vmem:[%s6212_s2 + $0x6b8] sm:$0xff] }
 0x103   : > { %2686 = vmatpush1.bf16.msra.mxu0 %v4145_v3  ;;  %v4202_v30 = vcombine.high %v659_v22, %v663_v23  ;;  %v715_v12 = vld [vmem:[%s6212_s2 + $0x858] sm:$0xff]  ;;  %v4201_v41 = vcombine.low %v659_v22, %v663_v23  ;;  %v4471_v22 = vld [vmem:[%s6214_s4 + $0x144] ss:$8 sps:$4 sm:$0xff]   ;;  %v4466_v23 = vld [vmem:[%s6214_s4 + $0x40] ss:$8 sps:$4 sm:$0xff]  }
 0x104   : > { %2651 = vmatpush2.bf16.msra.mxu1 %v4113_v15  ;;  %2687 = vmatprep.subr.bf16.mxu0 %v4138_v5  ;;  %v4225_v15 = vcombine.low %v683_v48, %v687_v49  ;;  %v719_v56 = vld [vmem:[%s6212_s2 + $0x878] sm:$0xff] }
 0x105   : > { %2652 = vmatprep.subr.bf16.mxu1 %v4106_v42  ;;  %v4065_v42 = vcombine.low %v523_v50, %v527_v51  ;;  %v643_v48 = vld [vmem:[%s6212_s2 + $0x618] sm:$0xff] }
 0x106   : > { %v647_v49 = vld [vmem:[%s6212_s2 + $0x638] sm:$0xff] }
 0x107   : > { %2688 = vmatpush1.bf16.msra.mxu0 %v4137_v14  ;;  %v671_v14 = vld [vmem:[%s6212_s2 + $0x6f8] sm:$0xff] }
 0x108   : > { %2653 = vmatpush2.bf16.msra.mxu1 %v4105_v17  ;;  %2689 = vmatprep.subr.bf16.mxu0 %v4130_v18  ;;  %v735_v17 = vld [vmem:[%s6212_s2 + $0x8f8] sm:$0xff]  ;;  %v4217_v18 = vcombine.low %v675_v63, %v679_v0  ;;  %v4210_v20 = vcombine.high %v667_v13, %v671_v14 }
 0x109   : > { %2654 = vmatprep.subr.bf16.mxu1 %v4098_v19  ;;  %v4057_v19 = vcombine.low %v515_v59, %v519_v2  ;;  %v4274_v21 = vcombine.high %v731_v16, %v735_v17  ;;  %v4273_v29 = vcombine.low %v731_v16, %v735_v17  ;;  %v707_v50 = vld [vmem:[%s6212_s2 + $0x818] sm:$0xff]  ;;  %v4185_v2 = vcombine.low %v643_v48, %v647_v49  ;;  %v4454_v17 = vld [vmem:[%s6214_s4 + $0x60] ss:$8 sps:$4 sm:$0xff]  }
 0x10a   : > { %v711_v51 = vld [vmem:[%s6212_s2 + $0x838] sm:$0xff] }
 0x10b   : > { %2690 = vmatpush1.bf16.msra.mxu0 %v4129_v24  ;;  %v744_v24 = vsub.s32 1, %v5550_v6  ;;  %v4250_v63 = vcombine.high %v707_v50, %v711_v51 }
 0x10c   : > { %2655 = vmatpush2.bf16.msra.mxu1 %v4097_v25  ;;  %2691 = vmatprep.subr.bf16.mxu0 %v4122_v26  ;;  %v723_v25 = vld [vmem:[%s6212_s2 + $0x898] sm:$0xff] }
 0x10d   : > { %2656 = vmatprep.subr.bf16.mxu1 %v4090_v27  ;;  %v727_v26 = vld [vmem:[%s6212_s2 + $0x8b8] sm:$0xff]  ;;  %v4209_v27 = vcombine.low %v667_v13, %v671_v14  ;;  %v4456_v13 = vld [vmem:[%s6214_s4 + $0x64] ss:$8 sps:$4 sm:$0xff]  }
 0x10e   : > { %v4266_v31 = vcombine.high %v723_v25, %v727_v26  ;;  %v4459_v14 = vld [vmem:[%s6214_s4 + $0x164] ss:$8 sps:$4 sm:$0xff]  }
 0x10f   : > { %2692 = vmatpush1.bf16.msra.mxu0 %v4121_v33  ;;  %v651_v33 = vld [vmem:[%s6212_s2 + $0x658] sm:$0xff] }
 0x110   : > { %2657 = vmatpush2.bf16.msra.mxu1 %v4089_v35  ;;  %2693 = vmatprep.subr.bf16.mxu0 %v4242_v37  ;;  %v655_v35 = vld [vmem:[%s6212_s2 + $0x678] sm:$0xff]  ;;  %v745_v37 = vrot.slane %v5568_v36, %v744_v24 }
 0x111   : > { %2658 = vmatprep.subr.bf16.mxu1 %v4082_v38 }
 0x112   : > { %v2281_v8 = vpop.f32.mrf.mxu0 }
 0x113   : > { %v2282_v52 = vadd.f32 %v2281_v8, %v741_v43  ;;  %v2324_v53 = vpop.f32.mrf.mxu1  ;;  %2694 = vmatpush2.bf16.msra.mxu0 %v4241_v44 }
 0x114   : > { %2659 = vmatpush2.bf16.msra.mxu1 %v4081_v45  ;;  %v5597_v55 = vpop.f32.mrf.mxu0  ;;  %2695 = vmatprep.subr.bf16.mxu0 %v4234_v46  ;;  %v4265_v45 = vcombine.low %v723_v25, %v727_v26  ;;  %v4194_v46 = vcombine.high %v651_v33, %v655_v35  ;;  %v4469_v25 = vld [vmem:[%s6214_s4 + $0x140] ss:$8 sps:$4 sm:$0xff]   ;;  %v4474_v26 = vld [vmem:[%s6214_s4 + $0x34] ss:$8 sps:$4 sm:$0xff]  }
 0x115   : > { %v2325_v60 = vadd.f32 %v2324_v53, %v2282_v52  ;;  %v5599_v61 = vpop.f32.mrf.mxu1  ;;  %2660 = vmatprep.subr.bf16.mxu1 %v4074_v47  ;;  %v4258_v47 = vcombine.high %v715_v12, %v719_v56 }
 0x116   : > { %v2285_v1 = vpop.f32.mrf.mxu0 }
 0x117   : > { %v2286_v3 = vadd.f32 %v2285_v1, %v741_v43  ;;  %2696 = vmatpush2.bf16.msra.mxu0 %v4233_v54  ;;  %v2328_v5 = vpop.f32.mrf.mxu1  ;;  %v4193_v54 = vcombine.low %v651_v33, %v655_v35  ;;  %v4478_v33 = vld [vmem:[%s6214_s4 + $0x20] ss:$8 sps:$4 sm:$0xff]  }
 0x118   : > { %2661 = vmatpush2.bf16.msra.mxu1 %v4073_v57  ;;  %2697 = vmatprep.subr.bf16.mxu0 %v4226_v58  ;;  %v2287_v28 = vpop.f32.mrf.mxu0  ;;  %v4481_v35 = vld [vmem:[%s6214_s4 + $0x120] ss:$8 sps:$4 sm:$0xff]  }
 0x119   : > { %v2329_v10 = vadd.f32 %v2328_v5, %v2286_v3  ;;  %2662 = vmatprep.subr.bf16.mxu1 %v4066_v62  ;;  %v2288_v43 = vadd.f32 %v2287_v28, %v745_v37  ;;  %v2330_v52 = vpop.f32.mrf.mxu1  ;;  %v4450_v5 = vld [vmem:[%s6214_s4 + $0x74] ss:$8 sps:$4 sm:$0xff]   ;;  %v4472_v28 = vld [vmem:[%s6214_s4 + $0x30] ss:$8 sps:$4 sm:$0xff]  }
 0x11b   : > { %2698 = vmatpush2.bf16.msra.mxu0 %v4225_v15  ;;  %v2331_v57 = vadd.f32 %v2330_v52, %v2288_v43  ;;  %v4249_v15 = vcombine.low %v707_v50, %v711_v51  ;;  %v4490_v43 = vld [vmem:[%s6214_s4] ss:$8 sps:$4 sm:$0xff]   ;;  %v4510_v51 = vld [vmem:[%s6214_s4 + $0xd4] ss:$8 sps:$4 sm:$0xff]  }
 0x11c   : > { %2663 = vmatpush2.bf16.msra.mxu1 %v4065_v42  ;;  %2699 = vmatprep.subr.bf16.mxu0 %v4218_v9  ;;  %v4453_v42 = vld [vmem:[%s6214_s4 + $0x174] ss:$8 sps:$4 sm:$0xff]   ;;  %v4505_v50 = vld [vmem:[%s6214_s4 + $0x1e0] ss:$8 sps:$4 sm:$0xff]  }
 0x11d   : > { %2664 = vmatprep.subr.bf16.mxu1 %v4058_v11  ;;  %v4451_v11 = vld [vmem:[%s6214_s4 + $0x170] ss:$8 sps:$4 sm:$0xff]  }
 0x11f   : > { %2700 = vmatpush2.bf16.msra.mxu0 %v4217_v18  ;;  %v4457_v18 = vld [vmem:[%s6214_s4 + $0x160] ss:$8 sps:$4 sm:$0xff]  }
 0x120   : > { %2665 = vmatpush2.bf16.msra.mxu1 %v4057_v19  ;;  %2701 = vmatprep.subr.bf16.mxu0 %v4210_v20  ;;  %v4462_v19 = vld [vmem:[%s6214_s4 + $0x54] ss:$8 sps:$4 sm:$0xff]   ;;  %v4463_v20 = vld [vmem:[%s6214_s4 + $0x150] ss:$8 sps:$4 sm:$0xff]  }
 0x121   : > { %2728 = vmatprep.subr.bf16.mxu1 %v4274_v21  ;;  %v4468_v21 = vld [vmem:[%s6214_s4 + $0x44] ss:$8 sps:$4 sm:$0xff]  }
 0x122   : > { %v2367_v38 = vpop.f32.mrf.mxu0 }
 0x123   : > { %v2368_v40 = vadd.f32 %v2367_v38, %v2325_v60  ;;  %2667 = vmatmul.mubr.bf16.vlgmr.msra.gmra.mxu1 %v5421_v4  ;;  %2702 = vmatpush2.bf16.msra.mxu0 %v4209_v27  ;;  %v2284_v4 = vadd.f32 %v5597_v55, %v745_v37  ;;  %v4186_v60 = vcombine.high %v643_v48, %v647_v49  ;;  %v4477_v27 = vld [vmem:[%s6214_s4 + $0x134] ss:$8 sps:$4 sm:$0xff]   ;;  %v4499_v48 = vld [vmem:[%s6214_s4 + $0x1f0] ss:$8 sps:$4 sm:$0xff]   ;;  %v4504_v49 = vld [vmem:[%s6214_s4 + $0xe4] ss:$8 sps:$4 sm:$0xff]  }
 0x124   : > { %2729 = vmatpush1.bf16.msra.mxu1 %v4273_v29  ;;  %v2369_v44 = vpop.f32.mrf.mxu0  ;;  %2703 = vmatprep.subr.bf16.mxu0 %v4202_v30  ;;  %v4475_v29 = vld [vmem:[%s6214_s4 + $0x130] ss:$8 sps:$4 sm:$0xff]   ;;  %v4480_v30 = vld [vmem:[%s6214_s4 + $0x24] ss:$8 sps:$4 sm:$0xff]   ;;  %v4486_v37 = vld [vmem:[%s6214_s4 + $0x14] ss:$8 sps:$4 sm:$0xff]  }
 0x125   : > { %2730 = vmatprep.subr.bf16.mxu1 %v4266_v31  ;;  %2752 = vmatprep.mubr.bf16.mxu1 %v4653_v32  ;;  %v4257_v32 = vcombine.low %v715_v12, %v719_v56  ;;  %v2763_v55 = vmax.f32 %v2368_v40, 0.0  ;;  %v2327_v0 = vadd.f32 %v5599_v61, %v2284_v4  ;;  %v4448_v61 = vld [vmem:[%s6214_s4 + $0x70] ss:$8 sps:$4 sm:$0xff]   ;;  %v4483_v31 = vld [vmem:[%s6214_s4 + $0x124] ss:$8 sps:$4 sm:$0xff]  }
 0x126   : > { %v2371_v8 = vpop.f32.mrf.mxu0  ;;  %v4489_v38 = vld [vmem:[%s6214_s4 + $0x114] ss:$8 sps:$4 sm:$0xff]   ;;  %v4484_v12 = vld [vmem:[%s6214_s4 + $0x10] ss:$8 sps:$4 sm:$0xff]   ;;  %v4492_v40 = vld [vmem:[%s6214_s4 + $0x4] ss:$8 sps:$4 sm:$0xff]  }
 0x127   : > { %v2372_v53 = vadd.f32 %v2371_v8, %v2329_v10  ;;  %2704 = vmatpush2.bf16.msra.mxu0 %v4201_v41  ;;  %v2370_v3 = vadd.f32 %v2369_v44, %v2327_v0  ;;  %v4487_v56 = vld [vmem:[%s6214_s4 + $0x110] ss:$8 sps:$4 sm:$0xff]   ;;  %v4495_v41 = vld [vmem:[%s6214_s4 + $0x104] ss:$8 sps:$4 sm:$0xff]   ;;  %v4493_v44 = vld [vmem:[%s6214_s4 + $0x100] ss:$8 sps:$4 sm:$0xff]  }
 0x128   : > { %2731 = vmatpush1.bf16.msra.mxu1 %v4265_v45  ;;  %v2373_v58 = vpop.f32.mrf.mxu0  ;;  %2705 = vmatprep.subr.bf16.mxu0 %v4194_v46  ;;  %v4498_v45 = vld [vmem:[%s6214_s4 + $0xf4] ss:$8 sps:$4 sm:$0xff]   ;;  %v4507_v4 = vld [vmem:[%s6214_s4 + $0x1e4] ss:$8 sps:$4 sm:$0xff]   ;;  %v4502_v8 = vld [vmem:[%s6214_s4 + $0xe0] ss:$8 sps:$4 sm:$0xff]  }
 0x129   : > { %v2771_v62 = vmax.f32 %v2372_v53, 0.0  ;;  %2732 = vmatprep.subr.bf16.mxu1 %v4258_v47  ;;  %v2374_v1 = vadd.f32 %v2373_v58, %v2331_v57  ;;  %v2764_v10 = vmax.f32 %v2370_v3, 0.0  ;;  %v4501_v46 = vld [vmem:[%s6214_s4 + $0x1f4] ss:$8 sps:$4 sm:$0xff]   ;;  %v4496_v47 = vld [vmem:[%s6214_s4 + $0xf0] ss:$8 sps:$4 sm:$0xff]  }
 0x12a   : > { %v4513_v53 = vld [vmem:[%s6214_s4 + $0x1d4] ss:$8 sps:$4 sm:$0xff]   ;;  %v4511_v57 = vld [vmem:[%s6214_s4 + $0x1d0] ss:$8 sps:$4 sm:$0xff]   ;;  %v4516_v58 = vld [vmem:[%s6214_s4 + $0xc4] ss:$8 sps:$4 sm:$0xff]  }
 0x12b   : > { %v5669_v59 = vpack.c.bf16 %v2771_v62, %v2763_v55  ;;  %2706 = vmatpush2.bf16.msra.mxu0 %v4193_v54  ;;  %v2772_v9 = vmax.f32 %v2374_v1, 0.0  ;;  %v4508_v54 = vld [vmem:[%s6214_s4 + $0xd0] ss:$8 sps:$4 sm:$0xff]   ;;  %v752_v55 = vsub.s32 3, %v5550_v6  ;;  %v4514_v62 = vld [vmem:[%s6214_s4 + $0xc0] ss:$8 sps:$4 sm:$0xff]  }
 0x12c   : > { %2733 = vmatpush1.bf16.msra.mxu1 %v4257_v32  ;;  %2707 = vmatprep.subr.bf16.mxu0 %v4186_v60  ;;  %v4519_v60 = vld [vmem:[%s6214_s4 + $0x1c4] ss:$8 sps:$4 sm:$0xff]   ;;  %v4522_v0 = vld [vmem:[%s6214_s4 + $0xb4] ss:$8 sps:$4 sm:$0xff]   ;;  %v748_v1 = vsub.s32 2, %v5550_v6 }
 0x12d   : > { %2734 = vmatprep.subr.bf16.mxu1 %v4250_v63  ;;  %v2780_v16 = vpack.c.bf16 %v2772_v9, %v2764_v10  ;;  %v4517_v63 = vld [vmem:[%s6214_s4 + $0x1c0] ss:$8 sps:$4 sm:$0xff]   ;;  %v4525_v3 = vld [vmem:[%s6214_s4 + $0x1b4] ss:$8 sps:$4 sm:$0xff]   ;;  %v4528_v9 = vld [vmem:[%s6214_s4 + $0xa4] ss:$8 sps:$4 sm:$0xff]  }
 0x12f   : > { %2708 = vmatpush2.bf16.msra.mxu0 %v4185_v2 }
 0x130   : > { %2735 = vmatpush1.bf16.msra.mxu1 %v4249_v15  ;;  %3567 = vmatprep.subr.bf16.mxu0 %v4450_v5  ;;  %v753_v15 = vrot.slane %v5568_v36, %v752_v55  ;;  %v4520_v5 = vld [vmem:[%s6214_s4 + $0xb0] ss:$8 sps:$4 sm:$0xff]  }
 0x131   : > { %3610 = vmatprep.subr.bf16.mxu1 %v4453_v42  ;;  %v4523_v42 = vld [vmem:[%s6214_s4 + $0x1b0] ss:$8 sps:$4 sm:$0xff]  }
 0x132   : > { %2710 = vmatmul.mubr.bf16.vlgmr.msra.gmra.mxu0 %v5431_v7  ;;  %v4465_v7 = vld [vmem:[%s6214_s4 + $0x154] ss:$8 sps:$4 sm:$0xff]   ;;  %v4550_v55 = vld [vmem:[%s6214_s4 + $0x250] ss:$8 sps:$4 sm:$0xff]  }
 0x133   : > { %4278 = vmatmul.mubr.msk.bf16.vlgmr.msra.gmra.mxu1 %vm2243_vm0, %v5479_v39  ;;  %3568 = vmatpush1.bf16.msra.mxu0 %v4448_v61  ;;  %v4460_v39 = vld [vmem:[%s6214_s4 + $0x50] ss:$8 sps:$4 sm:$0xff]   ;;  %v749_v61 = vrot.slane %v5568_v36, %v748_v1  ;;  %v4553_v1 = vld [vmem:[%s6214_s4 + $0x240] ss:$8 sps:$4 sm:$0xff]  }
 0x134   : > { %3599 = vmatprep.mubr.bf16.mxu0 %v2780_v16  ;;  %3611 = vmatpush1.bf16.msra.mxu1 %v4451_v11  ;;  %v4531_v11 = vld [vmem:[%s6214_s4 + $0x1a4] ss:$8 sps:$4 sm:$0xff]  }
 0x135   : > { %3569 = vmatprep.subr.bf16.mxu0 %v4456_v13  ;;  %3612 = vmatprep.subr.bf16.mxu1 %v4459_v14 }
 0x137   : > { %3570 = vmatpush1.bf16.msra.mxu0 %v4454_v17  ;;  %v4526_v17 = vld [vmem:[%s6214_s4 + $0xa0] ss:$8 sps:$4 sm:$0xff]  }
 0x138   : > { %3613 = vmatpush1.bf16.msra.mxu1 %v4457_v18  ;;  %3571 = vmatprep.subr.bf16.mxu0 %v4462_v19  ;;  %v4529_v19 = vld [vmem:[%s6214_s4 + $0x1a0] ss:$8 sps:$4 sm:$0xff]  }
 0x139   : > { %3614 = vmatprep.subr.bf16.mxu1 %v4465_v7  ;;  %v4534_v7 = vld [vmem:[%s6214_s4 + $0x94] ss:$8 sps:$4 sm:$0xff]  }
 0x13b   : > { %3572 = vmatpush1.bf16.msra.mxu0 %v4460_v39 }
 0x13c   : > { %3615 = vmatpush1.bf16.msra.mxu1 %v4463_v20  ;;  %3573 = vmatprep.subr.bf16.mxu0 %v4468_v21 }
 0x13d   : > { %3616 = vmatprep.subr.bf16.mxu1 %v4471_v22 }
 0x13f   : > { %3574 = vmatpush1.bf16.msra.mxu0 %v4466_v23  ;;  %v4537_v23 = vld [vmem:[%s6214_s4 + $0x194] ss:$8 sps:$4 sm:$0xff]  }
 0x140   : > { %3617 = vmatpush1.bf16.msra.mxu1 %v4469_v25  ;;  %3575 = vmatprep.subr.bf16.mxu0 %v4474_v26 }
 0x141   : > { %3618 = vmatprep.subr.bf16.mxu1 %v4477_v27 }
 0x143   : > { %3576 = vmatpush1.bf16.msra.mxu0 %v4472_v28 }
 0x144   : > { %3619 = vmatpush1.bf16.msra.mxu1 %v4475_v29  ;;  %3577 = vmatprep.subr.bf16.mxu0 %v4480_v30  ;;  %v4532_v30 = vld [vmem:[%s6214_s4 + $0x90] ss:$8 sps:$4 sm:$0xff]  }
 0x145   : > { %3620 = vmatprep.subr.bf16.mxu1 %v4483_v31 }
 0x147   : > { %3578 = vmatpush1.bf16.msra.mxu0 %v4478_v33  ;;  %v4535_v33 = vld [vmem:[%s6214_s4 + $0x190] ss:$8 sps:$4 sm:$0xff]  }
 0x148   : > { %3621 = vmatpush1.bf16.msra.mxu1 %v4481_v35  ;;  %3579 = vmatprep.subr.bf16.mxu0 %v4486_v37  ;;  %v4540_v35 = vld [vmem:[%s6214_s4 + $0x84] ss:$8 sps:$4 sm:$0xff]  }
 0x149   : > { %3622 = vmatprep.subr.bf16.mxu1 %v4489_v38 }
 0x14b   : > { %3580 = vmatpush1.bf16.msra.mxu0 %v4484_v12 }
 0x14c   : > { %3623 = vmatpush1.bf16.msra.mxu1 %v4487_v56  ;;  %3581 = vmatprep.subr.bf16.mxu0 %v4492_v40  ;;  %v4543_v56 = vld [vmem:[%s6214_s4 + $0x184] ss:$8 sps:$4 sm:$0xff]  }
 0x14d   : > { %3624 = vmatprep.subr.bf16.mxu1 %v4495_v41 }
 0x14f   : > { %3582 = vmatpush1.bf16.msra.mxu0 %v4490_v43 }
 0x150   : > { %3625 = vmatpush1.bf16.msra.mxu1 %v4493_v44  ;;  %3583 = vmatprep.subr.bf16.mxu0 %v4498_v45  ;;  %v4538_v44 = vld [vmem:[%s6214_s4 + $0x80] ss:$8 sps:$4 sm:$0xff]  }
 0x151   : > { %3626 = vmatprep.subr.bf16.mxu1 %v4501_v46  ;;  %v4541_v45 = vld [vmem:[%s6214_s4 + $0x180] ss:$8 sps:$4 sm:$0xff]   ;;  %v4546_v46 = vld [vmem:[%s6214_s4 + $0x274] ss:$8 sps:$4 sm:$0xff]  }
 0x153   : > { %3584 = vmatpush2.bf16.msra.mxu0 %v4496_v47  ;;  %v2410_v52 = vpop.f32.mrf.mxu1 }
 0x154   : > { %3627 = vmatpush2.bf16.msra.mxu1 %v4499_v48  ;;  %3585 = vmatprep.subr.bf16.mxu0 %v4504_v49  ;;  %v2411_v39 = vadd.f32 %v2410_v52, %v749_v61  ;;  %v4549_v52 = vld [vmem:[%s6214_s4 + $0x264] ss:$8 sps:$4 sm:$0xff]  }
 0x155   : > { %3628 = vmatprep.subr.bf16.mxu1 %v4507_v4  ;;  %v2412_v32 = vpop.f32.mrf.mxu1  ;;  %v4594_v4 = vld [vmem:[%s6214_s4 + $0x374] ss:$8 sps:$4 sm:$0xff]  }
 0x156   : > { %v2413_v14 = vadd.f32 %v2412_v32, %v753_v15  ;;  %v4552_v32 = vld [vmem:[%s6214_s4 + $0x254] ss:$8 sps:$4 sm:$0xff]  }
 0x157   : > { %3586 = vmatpush2.bf16.msra.mxu0 %v4502_v8  ;;  %v2414_v2 = vpop.f32.mrf.mxu1 }
 0x158   : > { %3629 = vmatpush2.bf16.msra.mxu1 %v4505_v50  ;;  %3587 = vmatprep.subr.bf16.mxu0 %v4510_v51  ;;  %v2415_v20 = vadd.f32 %v2414_v2, %v749_v61  ;;  %v4544_v51 = vld [vmem:[%s6214_s4 + $0x270] ss:$8 sps:$4 sm:$0xff]   ;;  %v4558_v2 = vld [vmem:[%s6214_s4 + $0x234] ss:$8 sps:$4 sm:$0xff]   ;;  %v4609_v61 = vld [vmem:[%s6214_s4 + $0x324] ss:$8 sps:$4 sm:$0xff]  }
 0x159   : > { %3630 = vmatprep.subr.bf16.mxu1 %v4513_v53  ;;  %v2416_v10 = vpop.f32.mrf.mxu1  ;;  %v4592_v53 = vld [vmem:[%s6214_s4 + $0x370] ss:$8 sps:$4 sm:$0xff]  }
 0x15a   : > { %v2417_v26 = vadd.f32 %v2416_v10, %v753_v15  ;;  %v4606_v15 = vld [vmem:[%s6214_s4 + $0x334] ss:$8 sps:$4 sm:$0xff]   ;;  %v4559_v10 = vld [vmem:[%s6214_s4 + $0x220] ss:$8 sps:$4 sm:$0xff]  }
 0x15b   : > { %3588 = vmatpush2.bf16.msra.mxu0 %v4508_v54 }
 0x15c   : > { %3631 = vmatpush2.bf16.msra.mxu1 %v4511_v57  ;;  %3589 = vmatprep.subr.bf16.mxu0 %v4516_v58  ;;  %v4597_v57 = vld [vmem:[%s6214_s4 + $0x364] ss:$8 sps:$4 sm:$0xff]   ;;  %v4547_v58 = vld [vmem:[%s6214_s4 + $0x260] ss:$8 sps:$4 sm:$0xff]  }
 0x15d   : > { %3632 = vmatprep.subr.bf16.mxu1 %v4519_v60  ;;  %v4595_v60 = vld [vmem:[%s6214_s4 + $0x360] ss:$8 sps:$4 sm:$0xff]  }
 0x15f   : > { %3590 = vmatpush2.bf16.msra.mxu0 %v4514_v62  ;;  %v4555_v62 = vld [vmem:[%s6214_s4 + $0x244] ss:$8 sps:$4 sm:$0xff]  }
 0x160   : > { %3633 = vmatpush2.bf16.msra.mxu1 %v4517_v63  ;;  %3591 = vmatprep.subr.bf16.mxu0 %v4522_v0  ;;  %v4598_v63 = vld [vmem:[%s6214_s4 + $0x350] ss:$8 sps:$4 sm:$0xff]   ;;  %v4603_v0 = vld [vmem:[%s6214_s4 + $0x344] ss:$8 sps:$4 sm:$0xff]  }
 0x161   : > { %3634 = vmatprep.subr.bf16.mxu1 %v4525_v3  ;;  %v4601_v3 = vld [vmem:[%s6214_s4 + $0x340] ss:$8 sps:$4 sm:$0xff]  }
 0x162   : > { %v2453_v13 = vpop.f32.mrf.mxu0 }
 0x163   : > { %v2496_v16 = vpop.f32.mrf.mxu1  ;;  %3592 = vmatpush2.bf16.msra.mxu0 %v4520_v5  ;;  %v2454_v27 = vadd.f32 %v2453_v13, %v2411_v39  ;;  %v4556_v5 = vld [vmem:[%s6214_s4 + $0x230] ss:$8 sps:$4 sm:$0xff]   ;;  %v4607_v13 = vld [vmem:[%s6214_s4 + $0x320] ss:$8 sps:$4 sm:$0xff]   ;;  %v4570_v39 = vld [vmem:[%s6214_s4 + $0x2f4] ss:$8 sps:$4 sm:$0xff]  }
 0x164   : > { %3635 = vmatpush2.bf16.msra.mxu1 %v4523_v42  ;;  %v2455_v18 = vpop.f32.mrf.mxu0  ;;  %3593 = vmatprep.subr.bf16.mxu0 %v4528_v9  ;;  %v4561_v42 = vld [vmem:[%s6214_s4 + $0x224] ss:$8 sps:$4 sm:$0xff]   ;;  %v4604_v9 = vld [vmem:[%s6214_s4 + $0x330] ss:$8 sps:$4 sm:$0xff]  }
 0x165   : > { %v2456_v21 = vadd.f32 %v2455_v18, %v2413_v14  ;;  %v2498_v22 = vpop.f32.mrf.mxu1  ;;  %3636 = vmatprep.subr.bf16.mxu1 %v4531_v11  ;;  %v2497_v41 = vadd.f32 %v2496_v16, %v2454_v27  ;;  %v4564_v11 = vld [vmem:[%s6214_s4 + $0x214] ss:$8 sps:$4 sm:$0xff]   ;;  %v4562_v16 = vld [vmem:[%s6214_s4 + $0x210] ss:$8 sps:$4 sm:$0xff]   ;;  %v4571_v27 = vld [vmem:[%s6214_s4 + $0x2e0] ss:$8 sps:$4 sm:$0xff]  }
 0x166   : > { %v2457_v25 = vpop.f32.mrf.mxu0  ;;  %v4612_v14 = vld [vmem:[%s6214_s4 + $0x314] ss:$8 sps:$4 sm:$0xff]   ;;  %v4610_v18 = vld [vmem:[%s6214_s4 + $0x310] ss:$8 sps:$4 sm:$0xff]  }
 0x167   : > { %v2458_v28 = vadd.f32 %v2457_v25, %v2415_v20  ;;  %v2500_v29 = vpop.f32.mrf.mxu1  ;;  %3594 = vmatpush2.bf16.msra.mxu0 %v4526_v17  ;;  %v2499_v37 = vadd.f32 %v2498_v22, %v2456_v21  ;;  %v2765_v8 = vmax.f32 %v2497_v41, 0.0  ;;  %v4567_v17 = vld [vmem:[%s6214_s4 + $0x204] ss:$8 sps:$4 sm:$0xff]   ;;  %v4613_v20 = vld [vmem:[%s6214_s4 + $0x300] ss:$8 sps:$4 sm:$0xff]  }
 0x168   : > { %3637 = vmatpush2.bf16.msra.mxu1 %v4529_v19  ;;  %v2459_v31 = vpop.f32.mrf.mxu0  ;;  %3595 = vmatprep.subr.bf16.mxu0 %v4534_v7  ;;  %v4615_v19 = vld [vmem:[%s6214_s4 + $0x304] ss:$8 sps:$4 sm:$0xff]   ;;  %v4565_v7 = vld [vmem:[%s6214_s4 + $0x200] ss:$8 sps:$4 sm:$0xff]   ;;  %v4618_v21 = vld [vmem:[%s6214_s4 + $0x3f4] ss:$8 sps:$4 sm:$0xff]  }
 0x169   : > { %v2501_v38 = vadd.f32 %v2500_v29, %v2458_v28  ;;  %v2460_v12 = vadd.f32 %v2459_v31, %v2417_v26  ;;  %3638 = vmatprep.subr.bf16.mxu1 %v4537_v23  ;;  %v2502_v40 = vpop.f32.mrf.mxu1  ;;  %v2766_v47 = vmax.f32 %v2499_v37, 0.0  ;;  %v4568_v22 = vld [vmem:[%s6214_s4 + $0x2f0] ss:$8 sps:$4 sm:$0xff]   ;;  %v4573_v23 = vld [vmem:[%s6214_s4 + $0x2e4] ss:$8 sps:$4 sm:$0xff]  }
 0x16a   : > { %v4616_v25 = vld [vmem:[%s6214_s4 + $0x3f0] ss:$8 sps:$4 sm:$0xff]   ;;  %v4621_v26 = vld [vmem:[%s6214_s4 + $0x3e4] ss:$8 sps:$4 sm:$0xff]   ;;  %v4576_v28 = vld [vmem:[%s6214_s4 + $0x2d4] ss:$8 sps:$4 sm:$0xff]  }
 0x16b   : > { %v2503_v43 = vadd.f32 %v2502_v40, %v2460_v12  ;;  %3596 = vmatpush2.bf16.msra.mxu0 %v4532_v30  ;;  %v2773_v48 = vmax.f32 %v2501_v38, 0.0  ;;  %v4619_v29 = vld [vmem:[%s6214_s4 + $0x3e0] ss:$8 sps:$4 sm:$0xff]   ;;  %v4624_v30 = vld [vmem:[%s6214_s4 + $0x3d4] ss:$8 sps:$4 sm:$0xff]  }
 0x16c   : > { %3639 = vmatpush2.bf16.msra.mxu1 %v4535_v33  ;;  %3597 = vmatprep.subr.bf16.mxu0 %v4540_v35  ;;  %v4574_v31 = vld [vmem:[%s6214_s4 + $0x2d0] ss:$8 sps:$4 sm:$0xff]   ;;  %v4579_v33 = vld [vmem:[%s6214_s4 + $0x2c4] ss:$8 sps:$4 sm:$0xff]   ;;  %v4577_v38 = vld [vmem:[%s6214_s4 + $0x2c0] ss:$8 sps:$4 sm:$0xff]  }
 0x16d   : > { %v2774_v49 = vmax.f32 %v2503_v43, 0.0  ;;  %3640 = vmatprep.subr.bf16.mxu1 %v4543_v56  ;;  %v2781_v54 = vpack.c.bf16 %v2773_v48, %v2765_v8  ;;  %v4622_v35 = vld [vmem:[%s6214_s4 + $0x3d0] ss:$8 sps:$4 sm:$0xff]   ;;  %v4627_v37 = vld [vmem:[%s6214_s4 + $0x3c4] ss:$8 sps:$4 sm:$0xff]  }
 0x16e   : > { %v4582_v12 = vld [vmem:[%s6214_s4 + $0x2b4] ss:$8 sps:$4 sm:$0xff]   ;;  %v4625_v56 = vld [vmem:[%s6214_s4 + $0x3c0] ss:$8 sps:$4 sm:$0xff]   ;;  %v4580_v41 = vld [vmem:[%s6214_s4 + $0x2b0] ss:$8 sps:$4 sm:$0xff]  }
 0x16f   : > { %v2782_v50 = vpack.c.bf16 %v2774_v49, %v2766_v47  ;;  %3598 = vmatpush2.bf16.msra.mxu0 %v4538_v44  ;;  %v4630_v40 = vld [vmem:[%s6214_s4 + $0x3b4] ss:$8 sps:$4 sm:$0xff]   ;;  %v4585_v43 = vld [vmem:[%s6214_s4 + $0x2a4] ss:$8 sps:$4 sm:$0xff]   ;;  %v4628_v44 = vld [vmem:[%s6214_s4 + $0x3b0] ss:$8 sps:$4 sm:$0xff]  }
 0x170   : > { %3641 = vmatpush2.bf16.msra.mxu1 %v4541_v45  ;;  %3653 = vmatprep.subr.bf16.mxu0 %v4546_v46  ;;  %v4633_v45 = vld [vmem:[%s6214_s4 + $0x3a4] ss:$8 sps:$4 sm:$0xff]   ;;  %v4583_v46 = vld [vmem:[%s6214_s4 + $0x2a0] ss:$8 sps:$4 sm:$0xff]   ;;  %v4588_v48 = vld [vmem:[%s6214_s4 + $0x294] ss:$8 sps:$4 sm:$0xff]  }
 0x171   : > { %3642 = vmatprep.mubr.bf16.mxu1 %v2782_v50  ;;  %3696 = vmatprep.subr.bf16.mxu1 %v4594_v4  ;;  %v4631_v49 = vld [vmem:[%s6214_s4 + $0x3a0] ss:$8 sps:$4 sm:$0xff]   ;;  %v4636_v4 = vld [vmem:[%s6214_s4 + $0x394] ss:$8 sps:$4 sm:$0xff]   ;;  %v4586_v8 = vld [vmem:[%s6214_s4 + $0x290] ss:$8 sps:$4 sm:$0xff]  }
 0x172   : > { %3600 = vmatmul.mubr.bf16.vlgmr.msra.gmra.mxu0 %v5669_v59  ;;  %v4600_v59 = vld [vmem:[%s6214_s4 + $0x354] ss:$8 sps:$4 sm:$0xff]  }
 0x173   : > { %3643 = vmatmul.mubr.bf16.vlgmr.msra.gmra.mxu1 %v2781_v54  ;;  %3654 = vmatpush1.bf16.msra.mxu0 %v4544_v51  ;;  %v4591_v51 = vld [vmem:[%s6214_s4 + $0x284] ss:$8 sps:$4 sm:$0xff]  }
 0x174   : > { %3655 = vmatprep.subr.bf16.mxu0 %v4549_v52  ;;  %3697 = vmatpush1.bf16.msra.mxu1 %v4592_v53  ;;  %v4634_v52 = vld [vmem:[%s6214_s4 + $0x390] ss:$8 sps:$4 sm:$0xff]   ;;  %v760_v53 = vsub.s32 5, %v5550_v6  ;;  %v4639_v54 = vld [vmem:[%s6214_s4 + $0x384] ss:$8 sps:$4 sm:$0xff]  }
 0x175   : > { %3698 = vmatprep.subr.bf16.mxu1 %v4597_v57  ;;  %v756_v57 = vsub.s32 4, %v5550_v6 }
 0x177   : > { %3656 = vmatpush1.bf16.msra.mxu0 %v4547_v58 }
 0x178   : > { %3657 = vmatprep.subr.bf16.mxu0 %v4552_v32  ;;  %3699 = vmatpush1.bf16.msra.mxu1 %v4595_v60  ;;  %v4589_v32 = vld [vmem:[%s6214_s4 + $0x280] ss:$8 sps:$4 sm:$0xff]  }
 0x179   : > { %3700 = vmatprep.subr.bf16.mxu1 %v4600_v59  ;;  %v4637_v59 = vld [vmem:[%s6214_s4 + $0x380] ss:$8 sps:$4 sm:$0xff]  }
 0x17b   : > { %3658 = vmatpush1.bf16.msra.mxu0 %v4550_v55  ;;  %v761_v55 = vrot.slane %v5568_v36, %v760_v53 }
 0x17c   : > { %3659 = vmatprep.subr.bf16.mxu0 %v4555_v62  ;;  %3701 = vmatpush1.bf16.msra.mxu1 %v4598_v63  ;;  %v3756_v62 = vld [vmem:[%s6216_s6 + $0x78] sm:$0xff]  ;;  %v757_v63 = vrot.slane %v5568_v36, %v756_v57 }
 0x17d   : > { %3702 = vmatprep.subr.bf16.mxu1 %v4603_v0 }
 0x17f   : > { %3660 = vmatpush1.bf16.msra.mxu0 %v4553_v1 }
 0x180   : > { %3661 = vmatprep.subr.bf16.mxu0 %v4558_v2  ;;  %3703 = vmatpush1.bf16.msra.mxu1 %v4601_v3 }
 0x181   : > { %3704 = vmatprep.subr.bf16.mxu1 %v4606_v15 }
 0x183   : > { %3662 = vmatpush1.bf16.msra.mxu0 %v4556_v5 }
 0x184   : > { %3663 = vmatprep.subr.bf16.mxu0 %v4561_v42  ;;  %3705 = vmatpush1.bf16.msra.mxu1 %v4604_v9 }
 0x185   : > { %3706 = vmatprep.subr.bf16.mxu1 %v4609_v61 }
 0x187   : > { %3664 = vmatpush1.bf16.msra.mxu0 %v4559_v10 }
 0x188   : > { %3665 = vmatprep.subr.bf16.mxu0 %v4564_v11  ;;  %3707 = vmatpush1.bf16.msra.mxu1 %v4607_v13 }
 0x189   : > { %3708 = vmatprep.subr.bf16.mxu1 %v4612_v14 }
 0x18b   : > { %3666 = vmatpush1.bf16.msra.mxu0 %v4562_v16 }
 0x18c   : > { %3667 = vmatprep.subr.bf16.mxu0 %v4567_v17  ;;  %3709 = vmatpush1.bf16.msra.mxu1 %v4610_v18 }
 0x18d   : > { %3710 = vmatprep.subr.bf16.mxu1 %v4615_v19 }
 0x18f   : > { %3668 = vmatpush1.bf16.msra.mxu0 %v4565_v7 }
 0x190   : > { %3669 = vmatprep.subr.bf16.mxu0 %v4570_v39  ;;  %3711 = vmatpush1.bf16.msra.mxu1 %v4613_v20 }
 0x191   : > { %3712 = vmatprep.subr.bf16.mxu1 %v4618_v21 }
 0x193   : > { %3670 = vmatpush2.bf16.msra.mxu0 %v4568_v22 }
 0x194   : > { %3671 = vmatprep.subr.bf16.mxu0 %v4573_v23  ;;  %3713 = vmatpush2.bf16.msra.mxu1 %v4616_v25 }
 0x195   : > { %3714 = vmatprep.subr.bf16.mxu1 %v4621_v26 }
 0x197   : > { %3672 = vmatpush2.bf16.msra.mxu0 %v4571_v27 }
 0x198   : > { %3673 = vmatprep.subr.bf16.mxu0 %v4576_v28  ;;  %3715 = vmatpush2.bf16.msra.mxu1 %v4619_v29  ;;  %v6073_v28 = vld [vmem:[%s6216_s6 + $0x70] sm:$0xff]  ;;  %v6078_v29 = vld [vmem:[%s6216_s6 + $0x68] sm:$0xff] }
 0x199   : > { %3716 = vmatprep.subr.bf16.mxu1 %v4624_v30  ;;  %v6083_v30 = vld [vmem:[%s6216_s6 + $0x60] sm:$0xff] }
 0x19b   : > { %3674 = vmatpush2.bf16.msra.mxu0 %v4574_v31  ;;  %v6089_v31 = vld [vmem:[%s6216_s6 + $0x58] sm:$0xff] }
 0x19c   : > { %3675 = vmatprep.subr.bf16.mxu0 %v4579_v33  ;;  %3717 = vmatpush2.bf16.msra.mxu1 %v4622_v35  ;;  %v4654_v33 = vmov 0.0   ;;  %v6096_v35 = vld [vmem:[%s6216_s6 + $0x50] sm:$0xff] }
 0x19d   : > { %3718 = vmatprep.subr.bf16.mxu1 %v4627_v37  ;;  %v6102_v37 = vld [vmem:[%s6216_s6 + $0x48] sm:$0xff] }
 0x19f   : > { %3676 = vmatpush2.bf16.msra.mxu0 %v4577_v38  ;;  %v6108_v38 = vld [vmem:[%s6216_s6 + $0x40] sm:$0xff] }
 0x1a0   : > { %3677 = vmatprep.subr.bf16.mxu0 %v4582_v12  ;;  %3719 = vmatpush2.bf16.msra.mxu1 %v4625_v56  ;;  %v6114_v12 = vld [vmem:[%s6216_s6 + $0x38] sm:$0xff]  ;;  %v6120_v56 = vld [vmem:[%s6216_s6 + $0x30] sm:$0xff] }
 0x1a1   : > { %3720 = vmatprep.subr.bf16.mxu1 %v4630_v40  ;;  %v6126_v40 = vld [vmem:[%s6216_s6 + $0x28] sm:$0xff] }
 0x1a2   : > { %v2539_v47 = vpop.f32.mrf.mxu0 }
 0x1a3   : > { %3678 = vmatpush2.bf16.msra.mxu0 %v4580_v41  ;;  %v2582_v58 = vpop.f32.mrf.mxu1  ;;  %v2540_v15 = vadd.f32 %v2539_v47, %v757_v63  ;;  %v3745_v41 = vld [vmem:[%s6216_s6 + $0x20] sm:$0xff] }
 0x1a4   : > { %3679 = vmatprep.subr.bf16.mxu0 %v4585_v43  ;;  %3721 = vmatpush2.bf16.msra.mxu1 %v4628_v44  ;;  %v2541_v50 = vpop.f32.mrf.mxu0  ;;  %v3744_v43 = vld [vmem:[%s6216_s6 + $0x18] sm:$0xff]  ;;  %v3743_v44 = vld [vmem:[%s6216_s6 + $0x10] sm:$0xff]  ;;  %v3739_v47 = vld [vmem:[%s6144_s13] sm:$0xff] }
 0x1a5   : > { %3722 = vmatprep.subr.bf16.mxu1 %v4633_v45  ;;  %v2584_v0 = vpop.f32.mrf.mxu1  ;;  %v2542_v2 = vadd.f32 %v2541_v50, %v761_v55  ;;  %v2583_v13 = vadd.f32 %v2582_v58, %v2540_v15  ;;  %v3742_v45 = vld [vmem:[%s6216_s6 + $0x8] sm:$0xff] }
 0x1a6   : > { %v2543_v60 = vpop.f32.mrf.mxu0 }
 0x1a7   : > { %3680 = vmatpush2.bf16.msra.mxu0 %v4583_v46  ;;  %v2544_v3 = vadd.f32 %v2543_v60, %v757_v63  ;;  %v2586_v5 = vpop.f32.mrf.mxu1  ;;  %v2585_v10 = vadd.f32 %v2584_v0, %v2542_v2  ;;  %v3741_v46 = vld [vmem:[%s6216_s6] sm:$0xff] }
 0x1a8   : > { %3681 = vmatprep.subr.bf16.mxu0 %v4588_v48  ;;  %3723 = vmatpush2.bf16.msra.mxu1 %v4631_v49  ;;  %v2545_v1 = vpop.f32.mrf.mxu0 }
 0x1a9   : > { %3724 = vmatprep.subr.bf16.mxu1 %v4636_v4  ;;  %v2546_v9 = vadd.f32 %v2545_v1, %v761_v55  ;;  %v2587_v11 = vadd.f32 %v2586_v5, %v2544_v3  ;;  %v2588_v14 = vpop.f32.mrf.mxu1  ;;  %v768_v4 = vsub.s32 7, %v5550_v6 }
 0x1ab   : > { %3682 = vmatpush2.bf16.msra.mxu0 %v4586_v8  ;;  %v2589_v17 = vadd.f32 %v2588_v14, %v2546_v9  ;;  %v764_v8 = vsub.s32 6, %v5550_v6  ;;  %v3846_v6 = vld [vmem:[%s6185_s26 + $0x8] sm:$0xff] }
 0x1ac   : > { %3683 = vmatprep.subr.bf16.mxu0 %v4591_v51  ;;  %3725 = vmatpush2.bf16.msra.mxu1 %v4634_v52  ;;  %v769_v51 = vrot.slane %v5568_v36, %v768_v4 }
 0x1ad   : > { %3726 = vmatprep.subr.bf16.mxu1 %v4639_v54  ;;  %v765_v52 = vrot.slane %v5568_v36, %v764_v8 }
 0x1af   : > { %3684 = vmatpush2.bf16.msra.mxu0 %v4589_v32 }
 0x1b0   : > { %3779 = vmatprep.subr.mxu0 %v3756_v62  ;;  %3727 = vmatpush2.bf16.msra.mxu1 %v4637_v59 }
 0x1b1   : > { %4414 = vmatprep.subr.mxu1 %v3756_v62 }
 0x1b2   : > { %v2625_v42 = vpop.f32.mrf.mxu0 }
 0x1b3   : > { %v2626_v7 = vadd.f32 %v2625_v42, %v2583_v13 }
 0x1b4   : > { %v2627_v61 = vpop.f32.mrf.mxu0 }
 0x1b5   : > { %v2628_v18 = vadd.f32 %v2627_v61, %v2585_v10  ;;  %v2767_v25 = vmax.f32 %v2626_v7, 0.0 }
 0x1b6   : > { %v2629_v16 = vpop.f32.mrf.mxu0 }
 0x1b7   : > { %v2630_v19 = vadd.f32 %v2629_v16, %v2587_v11  ;;  %v2768_v22 = vmax.f32 %v2628_v18, 0.0 }
 0x1b8   : > { %v2631_v39 = vpop.f32.mrf.mxu0 }
 0x1b9   : > { %v2632_v20 = vadd.f32 %v2631_v39, %v2589_v17  ;;  %v2775_v21 = vmax.f32 %v2630_v19, 0.0  ;;  %v3740_v19 = vld [vmem:[%s6144_s13 + $0x8] sm:$0xff] }
 0x1bb   : > { %v2776_v23 = vmax.f32 %v2632_v20, 0.0  ;;  %v2783_v27 = vpack.c.bf16 %v2775_v21, %v2767_v25 }
 0x1bd   : > { %v2784_v26 = vpack.c.bf16 %v2776_v23, %v2768_v22  ;;  %v2915_v22 = vld [vmem:[%s6215_s5] sm:$0x3] }
 0x1bf   : > { %3685 = vmatprep.mubr.bf16.mxu0 %v2784_v26  ;;  %v2920_v26 = vrot.slane %v2915_v22, %v740_v34 }
 0x1c0   : > { %3686 = vmatmul.mubr.bf16.vlgmr.msra.gmra.mxu0 %v2783_v27 }
 0x1c1   : > { %3780 = vmatpush1.msra.mxu0 %v6073_v28  ;;  %3827 = vmatprep.mubr.f32.mxu0 %v4654_v33 }
 0x1c2   : > { %3781 = vmatprep.subr.mxu0 %v6078_v29 }
 0x1c3   : > { %3782 = vmatpush1.msra.mxu0 %v6083_v30 }
 0x1c4   : > { %3783 = vmatprep.subr.mxu0 %v6089_v31 }
 0x1c5   : > { %3784 = vmatpush1.msra.mxu0 %v6096_v35 }
 0x1c6   : > { %3785 = vmatprep.subr.mxu0 %v6102_v37 }
 0x1c7   : > { %3786 = vmatpush1.msra.mxu0 %v6108_v38 }
 0x1c8   : > { %3787 = vmatprep.subr.mxu0 %v6114_v12 }
 0x1c9   : > { %3788 = vmatpush1.msra.mxu0 %v6120_v56 }
 0x1ca   : > { %3789 = vmatprep.subr.mxu0 %v6126_v40 }
 0x1cb   : > { %3790 = vmatpush1.msra.mxu0 %v3745_v41 }
 0x1cc   : > { %3791 = vmatprep.subr.mxu0 %v3744_v43 }
 0x1cd   : > { %3792 = vmatpush1.msra.mxu0 %v3743_v44 }
 0x1ce   : > { %3793 = vmatprep.subr.mxu0 %v3742_v45 }
 0x1cf   : > { %3794 = vmatpush1.msra.mxu0 %v3741_v46 }
 0x1d0   : > { %4407 = vmatmul.mubr.msk.f32.vlgmr.msra.gmra.mxu0 %vm2243_vm0, %v3739_v47 }
 0x1e3   : > { %v2668_v48 = vpop.f32.mrf.mxu1 }
 0x1e4   : > { %v2669_v32 = vadd.f32 %v2668_v48, %v765_v52 }
 0x1e5   : > { %v2670_v49 = vpop.f32.mrf.mxu1 }
 0x1e6   : > { %v2671_v57 = vadd.f32 %v2670_v49, %v769_v51 }
 0x1e7   : > { %v2672_v50 = vpop.f32.mrf.mxu1 }
 0x1e8   : > { %v2673_v59 = vadd.f32 %v2672_v50, %v765_v52  ;;  %v3840_v50 = vld [vmem:[%s6193_s28] sm:$0xff] }
 0x1e9   : > { %v2674_v53 = vpop.f32.mrf.mxu1 }
 0x1ea   : > { %v2675_v1 = vadd.f32 %v2674_v53, %v769_v51 }
 0x1f2   : > { %v2711_v54 = vpop.f32.mrf.mxu0 }
 0x1f3   : > { %v2754_v58 = vpop.f32.mrf.mxu1  ;;  %v2712_v63 = vadd.f32 %v2711_v54, %v2669_v32 }
 0x1f4   : > { %v2713_v60 = vpop.f32.mrf.mxu0 }
 0x1f5   : > { %v2714_v55 = vadd.f32 %v2713_v60, %v2671_v57  ;;  %v2756_v62 = vpop.f32.mrf.mxu1  ;;  %v2755_v61 = vadd.f32 %v2754_v58, %v2712_v63  ;;  %v3841_v58 = vld [vmem:[%s6193_s28 + $0x8] sm:$0xff] }
 0x1f6   : > { %v2715_v0 = vpop.f32.mrf.mxu0 }
 0x1f7   : > { %v2716_v2 = vadd.f32 %v2715_v0, %v2673_v59  ;;  %v2758_v3 = vpop.f32.mrf.mxu1  ;;  %v2757_v5 = vadd.f32 %v2756_v62, %v2714_v55  ;;  %v2769_v16 = vmax.f32 %v2755_v61, 0.0  ;;  %v3847_v55 = vld [vmem:[%s6185_s26 + $0x10] sm:$0xff] }
 0x1f8   : > { %v2717_v15 = vpop.f32.mrf.mxu0 }
 0x1f9   : > { %v2759_v42 = vadd.f32 %v2758_v3, %v2716_v2  ;;  %v2718_v9 = vadd.f32 %v2717_v15, %v2675_v1  ;;  %v2760_v36 = vpop.f32.mrf.mxu1  ;;  %v2770_v13 = vmax.f32 %v2757_v5, 0.0  ;;  %v3848_v2 = vld [vmem:[%s6185_s26 + $0x18] sm:$0xff] }
 0x1fb   : > { %v2761_v10 = vadd.f32 %v2760_v36, %v2718_v9  ;;  %v2777_v11 = vmax.f32 %v2759_v42, 0.0 }
 0x1fd   : > { %v2778_v14 = vmax.f32 %v2761_v10, 0.0  ;;  %v2785_v18 = vpack.c.bf16 %v2777_v11, %v2769_v16  ;;  %v3842_v10 = vld [vmem:[%s6193_s28 + $0x10] sm:$0xff]  ;;  %v3843_v16 = vld [vmem:[%s6193_s28 + $0x18] sm:$0xff] }
 0x1ff   : > { %v2786_v17 = vpack.c.bf16 %v2778_v14, %v2770_v13 }
 0x201   : > { %3728 = vmatprep.mubr.bf16.mxu1 %v2786_v17 }
 0x202   : > { %3729 = vmatmul.mubr.bf16.vlgmr.msra.gmra.mxu1 %v2785_v18 }
 0x203   : > { %4422 = vmatpush1.msra.mxu1 %v6073_v28  ;;  %3833 = vmatprep.mubr.f32.mxu1 %v4654_v33 }
 0x204   : > { %4415 = vmatprep.subr.mxu1 %v6078_v29  ;;  %v2924_v29 = vrot.slane %v2915_v22, %v744_v24 }
 0x205   : > { %4423 = vmatpush1.msra.mxu1 %v6083_v30 }
 0x206   : > { %4416 = vmatprep.subr.mxu1 %v6089_v31 }
 0x207   : > { %4424 = vmatpush1.msra.mxu1 %v6096_v35  ;;  %v3845_v35 = vld [vmem:[%s6185_s26] sm:$0xff] }
 0x208   : > { %4417 = vmatprep.subr.mxu1 %v6102_v37  ;;  %v3849_v37 = vstv %s3844_s22 }
 0x209   : > { %4425 = vmatpush1.msra.mxu1 %v6108_v38  ;;  %v3851_v47 = vmul.f32 %v3849_v37, %v3846_v6  ;;  %v3852_v5 = vmul.f32 %v3849_v37, %v3847_v55  ;;  %v3853_v9 = vmul.f32 %v3849_v37, %v3848_v2 }
 0x20a   : > { %4418 = vmatprep.subr.mxu1 %v6114_v12 }
 0x20b   : > { %4426 = vmatpush1.msra.mxu1 %v6120_v56 }
 0x20c   : > { %4419 = vmatprep.subr.mxu1 %v6126_v40 }
 0x20d   : > { %4427 = vmatpush1.msra.mxu1 %v3745_v41  ;;  %v3850_v41 = vmul.f32 %v3849_v37, %v3845_v35 }
 0x20e   : > { %4420 = vmatprep.subr.mxu1 %v3744_v43 }
 0x20f   : > { %4428 = vmatpush1.msra.mxu1 %v3743_v44 }
 0x210   : > { %4421 = vmatprep.subr.mxu1 %v3742_v45 }
 0x211   : > { %4429 = vmatpush1.msra.mxu1 %v3741_v46 }
 0x212   : > { %4408 = vmatmul.mubr.msk.f32.vlgmr.msra.gmra.mxu1 %vm2243_vm0, %v3740_v19 }
 0x232   : > { %v3601_v7 = vpop.f32.mrf.mxu0 }
 0x233   : > { %v3644_v23 = vpop.f32.mrf.mxu1  ;;  %v3602_v30 = vadd.f32 %v3601_v7, %v2920_v26 }
 0x234   : > { %v3603_v39 = vpop.f32.mrf.mxu0 }
 0x235   : > { %v3646_v27 = vpop.f32.mrf.mxu1  ;;  %v3604_v34 = vadd.f32 %v3603_v39, %v2924_v29  ;;  %v3645_v38 = vadd.f32 %v3644_v23, %v3602_v30 }
 0x236   : > { %v3605_v20 = vpop.f32.mrf.mxu0 }
 0x237   : > { %v3648_v31 = vpop.f32.mrf.mxu1  ;;  %v3647_v40 = vadd.f32 %v3646_v27, %v3604_v34  ;;  %v3606_v49 = vadd.f32 %v3605_v20, %v2920_v26 }
 0x238   : > { %v3607_v21 = vpop.f32.mrf.mxu0 }
 0x239   : > { %v3650_v12 = vpop.f32.mrf.mxu1  ;;  %v3608_v52 = vadd.f32 %v3607_v21, %v2924_v29  ;;  %v3649_v32 = vadd.f32 %v3648_v31, %v3606_v49 }
 0x23b   : > { %v3651_v62 = vadd.f32 %v3650_v12, %v3608_v52 }
 0x280   : > { %v3687_v25 = vpop.f32.mrf.mxu0 }
 0x281   : > { %v3688_v24 = vadd.f32 %v3687_v25, %v3645_v38 }
 0x282   : > { %v3689_v28 = vpop.f32.mrf.mxu0 }
 0x283   : > { %v3690_v45 = vadd.f32 %v3689_v28, %v3647_v40 }
 0x284   : > { %v3691_v33 = vpop.f32.mrf.mxu0 }
 0x285   : > { %v3692_v63 = vadd.f32 %v3691_v33, %v3649_v32 }
 0x286   : > { %v3693_v56 = vpop.f32.mrf.mxu0 }
 0x287   : > { %v3694_v3 = vadd.f32 %v3693_v56, %v3651_v62 }
 0x290   : > { %v3829_v44 = vpop.f32.mrf.mxu0 }
 0x292   : > { %v3831_v51 = vpop.f32.mrf.mxu0 }
 0x2c2   : > { %v3730_v43 = vpop.f32.mrf.mxu1 }
 0x2c3   : > { %v3731_v46 = vadd.f32 %v3730_v43, %v3688_v24 }
 0x2c4   : > { %v3732_v48 = vpop.f32.mrf.mxu1 }
 0x2c5   : > { %v3733_v4 = vadd.f32 %v3732_v48, %v3690_v45  ;;  %v3854_v8 = vadd.f32 %v3850_v41, %v3731_v46 }
 0x2c6   : > { %v3734_v57 = vpop.f32.mrf.mxu1 }
 0x2c7   : > { %v3858_v53 = vmul.f32 %v3854_v8, %v3829_v44  ;;  %v3855_v54 = vadd.f32 %v3851_v47, %v3733_v4  ;;  %v3735_v15 = vadd.f32 %v3734_v57, %v3692_v63 }
 0x2c8   : > { %v3736_v1 = vpop.f32.mrf.mxu1 }
 0x2c9   : > { %v3862_v60 = vadd.f32 %v3858_v53, %v3840_v50  ;;  %v3859_v59 = vmul.f32 %v3855_v54, %v3831_v51  ;;  %v3737_v42 = vadd.f32 %v3736_v1, %v3694_v3  ;;  %v3856_v61 = vadd.f32 %v3852_v5, %v3735_v15 }
 0x2cb   : > { %3866 = vst [vmem:[%s439_s30] sm:$0xff] %v3862_v60  ;;  %v3863_v0 = vadd.f32 %v3859_v59, %v3841_v58  ;;  %v3857_v13 = vadd.f32 %v3853_v9, %v3737_v42 }
 0x2cd   : > { %3867 = vst.msk [vmem:[%s439_s30 + $0x8] sm:$0xff] %vm2243_vm0, %v3863_v0 }
 0x2d2   : > { %v3835_v36 = vpop.f32.mrf.mxu1 }
 0x2d3   : > { %v3860_v11 = vmul.f32 %v3856_v61, %v3835_v36 }
 0x2d4   : > { %v3837_v14 = vpop.f32.mrf.mxu1 }
 0x2d5   : > { %v3864_v17 = vadd.f32 %v3860_v11, %v3842_v10  ;;  %v3861_v18 = vmul.f32 %v3857_v13, %v3837_v14 }
 0x2d7   : > { %3868 = vst [vmem:[%s439_s30 + $0x10] sm:$0xff] %v3864_v17  ;;  %v3865_v19 = vadd.f32 %v3861_v18, %v3843_v16 }
 0x2d9   : > { %3869 = vst.msk [vmem:[%s439_s30 + $0x18] sm:$0xff] %vm2243_vm0, %v3865_v19 }
 0x2da PF: > { %s21_s15 = sadd.s32 1, %s4651_s15  }
 0x2db   : > { %p18_p4 = scmp.ge.s32.totalorder %s21_s15, 4  }
 0x2dd   :  { %20 = sbr.rel (!%p18_p4) target bundleno = 2 (0x2), region = 99 }

</bundles_post_ra>
